<compile_context>
chip_gen: v7x
topology: tpu7x:2x2x1
jax: 0.10.0
libtpu: 0.0.40
codegen_flags: <defaults>
</compile_context>

<pallas_src>
import functools

import jax
import jax.numpy as jnp
from jax.experimental import pallas as pl
from jax.experimental.pallas import tpu as pltpu


def _pick_windows_per_step(B, N, rows_target=2048):
    """How many windows (of N tokens each) to pack into one grid step.

    Priority 1: keep >= 2 grid steps whenever B >= 2 (the grid axis is
    'parallel', so a 1-step grid would idle one v7x TensorCore).
    Priority 2: within that, pack as many windows as fit `rows_target` rows so
    the ~0.35us/step pipeline overhead and MXU pushes are amortised (v5e/v6e).
    """
    if N % 8 != 0:
        return B  # full-batch block keeps the (8,128) divisibility rule trivially
    divisors = [d for d in range(1, B + 1) if B % d == 0]
    fits = [d for d in divisors if d * N <= rows_target] or [1]
    if B >= 2:
        multi = [d for d in fits if B // d >= 2]
        if multi:
            return max(multi)
    return max(fits)


def attention_kernel(x_ref, wqkv_ref, wproj_ref, bproj_ref, rquv_ref, efull_ref,
                     o_ref, qkv_sc,
                     *, num_heads, head_dim, windows_per_step, tokens_per_window,
                     rel_kd):
    # x_ref:     (M, C)       bf16   M = windows_per_step * N (flattened windows)
    # wqkv_ref:  (C, P)       bf16   fused [q(scaled) | k | v] weight, P = pad128(3*nh*hd)
    # wproj_ref: (nh*hd, C)   bf16   output projection
    # bproj_ref: (1, C)       f32
    # rquv_ref:  (N, kd*hd)   bf16   gathered [Rh | Rw] rel-pos tables, flattened
    # efull_ref: (kd*hd, N)   bf16   0/1 expansion -> (N, N) rel-pos bias in ONE matmul
    # o_ref:     (M, C)
    # qkv_sc:    (M, P)       bf16   fused projection scratch (lane-dense stores)
    N = tokens_per_window
    hd = head_dim
    nh = num_heads
    ahd = nh * hd

    # --- one projection matmul for q, k, v over all heads and all windows ---
    qkv_sc[...] = jnp.dot(x_ref[...], wqkv_ref[...],
                          preferred_element_type=jnp.float32).astype(qkv_sc.dtype)

    rquv = rquv_ref[...]            # (N, kd*hd) bf16
    efull = efull_ref[...]          # (kd*hd, N) bf16
    wproj = wproj_ref[...]          # (ahd, C)   bf16
    bias = bproj_ref[...]           # (1, C)     f32

    # Static (fully-unrolled) loops: trip counts are small and compile-time.
    for w in range(windows_per_step):
        r0 = w * N
        head_outs = []
        for h in range(nh):
            qh = qkv_sc[r0:r0 + N, h * hd:(h + 1) * hd]                  # (N, hd) bf16, pre-scaled
            kh = qkv_sc[r0:r0 + N, ahd + h * hd:ahd + (h + 1) * hd]      # (N, hd) bf16
            vh = qkv_sc[r0:r0 + N, 2 * ahd + h * hd:2 * ahd + (h + 1) * hd]

            # attention logits  q @ k^T  (bf16 operands, f32 accumulation)
            s = jax.lax.dot_general(qh, kh, (((1,), (1,)), ((), ())),
                                    preferred_element_type=jnp.float32)  # (N, N)

            # decomposed relative-position bias: replicate q across the kd
            # segments (lane tile), one elementwise multiply, ONE matmul.
            # (On v5e the bf16 elementwise mul round-trips through f32 in the
            #  VPU; on v6e/v7x it runs natively at 2x vreg throughput.)
            qt = jnp.tile(qh, (1, rel_kd))                               # (N, kd*hd) bf16
            s = s + jnp.dot(qt * rquv, efull,
                            preferred_element_type=jnp.float32)

            # softmax over keys; flash-style: normalise after attn @ v
            s = s - jnp.max(s, axis=-1, keepdims=True)
            p = jnp.exp(s)
            l = jnp.sum(p, axis=-1, keepdims=True)
            o_h = jnp.dot(p.astype(vh.dtype), vh,
                          preferred_element_type=jnp.float32)            # (N, hd) f32
            o_h = o_h * pl.reciprocal(l, approx=True)
            head_outs.append(o_h.astype(jnp.bfloat16))

        # single (N, ahd) @ (ahd, C) output projection and ONE store per window
        o_cat = jnp.concatenate(head_outs, axis=-1)                      # (N, ahd) bf16
        y_w = jnp.dot(o_cat, wproj, preferred_element_type=jnp.float32) + bias
        o_ref[r0:r0 + N, :] = y_w.astype(o_ref.dtype)

    # TODO(synk): attn_drop / proj_drop are identity at inference (p=0.0) and the
    # qkv_bias=True branch (module default False) is not implemented.


def attention_forward(x, wqkv, wproj, bproj, rel_pos_h, rel_pos_w,
                      window_size, num_heads, head_dim,
                      *, compute_dtype=jnp.bfloat16, windows_per_step=None):
    B, N, C = x.shape
    ahd = num_heads * head_dim
    scale = head_dim ** (-0.5)
    q_h, q_w = window_size
    k_h, k_w = window_size
    kd = k_h + k_w
    assert N == q_h * q_w
    assert wqkv.shape == (3 * ahd, C) and wproj.shape == (C, ahd)

    if windows_per_step is None:
        windows_per_step = _pick_windows_per_step(B, N)
    assert B % windows_per_step == 0
    grid_b = B // windows_per_step
    M = windows_per_step * N

    # ---- glue: rel-pos gathers + fused 0/1 expansion matrix (indexing only) ----
    dist_h = jnp.arange(q_h)[:, None] - jnp.arange(k_h)[None, :] + (k_h - 1)
    dist_w = jnp.arange(q_w)[:, None] - jnp.arange(k_w)[None, :] + (k_w - 1)
    Rh = rel_pos_h[dist_h]                                   # (q_h, k_h, hd)
    Rw = rel_pos_w[dist_w]                                   # (q_w, k_w, hd)
    qx = jnp.arange(N) // q_w
    qy = jnp.arange(N) % q_w
    rquv = jnp.concatenate([Rh[qx], Rw[qy]], axis=1)         # (N, kd, hd)
    rquv_flat = rquv.reshape(N, kd * head_dim).astype(compute_dtype)     # (N, kd*hd)
    kidx = jnp.arange(N)
    eh = (kidx[None, :] // k_w) == jnp.arange(k_h)[:, None]
    ew = (kidx[None, :] % k_w) == jnp.arange(k_w)[:, None]
    ecat = jnp.concatenate([eh, ew], axis=0)                 # (kd, N) one-hot rows
    e_full = jnp.repeat(ecat, head_dim, axis=0).astype(compute_dtype)    # (kd*hd, N), exact 0/1

    # ---- fused QKV weight: columns [q(scaled) | k | v], head-major per block ----
    w_all = wqkv.T                                           # (C, 3*ahd): col = s*ahd + h*hd + d
    w_all = jnp.concatenate([w_all[:, :ahd] * scale, w_all[:, ahd:]], axis=1)
    ncols = 3 * ahd
    pad = (-ncols) % 128                                     # lane-dense scratch stores
    if pad:
        w_all = jnp.pad(w_all, ((0, 0), (0, pad)))
    ncols_pad = ncols + pad
    w_all = w_all.astype(compute_dtype)

    wproj_t = wproj.T.astype(compute_dtype)                  # (ahd, C)
    bproj2 = bproj.reshape(1, C).astype(jnp.float32)

    x_flat = x.reshape(B * N, C).astype(compute_dtype)

    kernel = functools.partial(
        attention_kernel, num_heads=num_heads, head_dim=head_dim,
        windows_per_step=windows_per_step, tokens_per_window=N, rel_kd=kd)

    grid_spec = pltpu.PrefetchScalarGridSpec(
        num_scalar_prefetch=0,
        grid=(grid_b,),
        in_specs=[
            pl.BlockSpec((M, C), lambda b: (b, 0)),                    # x slab
            pl.BlockSpec((C, ncols_pad), lambda b: (0, 0)),            # fused QKV weight
            pl.BlockSpec((ahd, C), lambda b: (0, 0)),                  # proj weight
            pl.BlockSpec((1, C), lambda b: (0, 0)),                    # proj bias
            pl.BlockSpec((N, kd * head_dim), lambda b: (0, 0)),        # rel-pos tables
            pl.BlockSpec((kd * head_dim, N), lambda b: (0, 0)),        # expansion matrix
        ],
        out_specs=pl.BlockSpec((M, C), lambda b: (b, 0)),
        scratch_shapes=[pltpu.VMEM((M, ncols_pad), compute_dtype)],    # fused qkv scratch
    )

    out_flat = pl.pallas_call(
        kernel,
        out_shape=jax.ShapeDtypeStruct((B * N, C), x.dtype),
        grid_spec=grid_spec,
        compiler_params=pltpu.CompilerParams(
            dimension_semantics=("parallel",)),
    )(x_flat, w_all, wproj_t, bproj2, rquv_flat, e_full)

    return out_flat.reshape(B, N, C)


def attention_reference(x, wqkv, wproj, bproj, rel_pos_h, rel_pos_w,
                        window_size, num_heads, head_dim):
    """Pure-JAX f32 replica of the PyTorch forward (for verification)."""
    B, N, C = x.shape
    ahd = num_heads * head_dim
    scale = head_dim ** (-0.5)
    q_h, q_w = window_size
    k_h, k_w = window_size

    qkv = x @ wqkv.T                                               # (B, N, 3*AHD)
    qkv = qkv.reshape(B, N, 3, num_heads, head_dim).transpose(2, 0, 3, 1, 4)
    q, k, v = qkv[0], qkv[1], qkv[2]                               # (B, nH, N, hd)
    q = q * scale
    attn = jnp.einsum('bhqd,bhkd->bhqk', q, k)

    dist_h = jnp.arange(q_h)[:, None] - jnp.arange(k_h)[None, :] + (k_h - 1)
    dist_w = jnp.arange(q_w)[:, None] - jnp.arange(k_w)[None, :] + (k_w - 1)
    Rh = rel_pos_h[dist_h]
    Rw = rel_pos_w[dist_w]
    r_q = q.reshape(B, num_heads, q_h, q_w, head_dim)
    rel_h = jnp.einsum('byhwc,hkc->byhwk', r_q, Rh)
    rel_w = jnp.einsum('byhwc,wkc->byhwk', r_q, Rw)
    attn = (attn.reshape(B, num_heads, q_h, q_w, k_h, k_w)
            + rel_h[..., :, None] + rel_w[..., None, :]).reshape(B, num_heads, N, N)

    attn = jax.nn.softmax(attn, axis=-1)
    out = jnp.einsum('bhqk,bhkd->bhqd', attn, v)
    out = out.transpose(0, 2, 1, 3).reshape(B, N, ahd)
    return out @ wproj.T + bproj


if __name__ == "__main__":
    # Small shapes consistent with the module: dim=32, num_heads=4, head_dim=8,
    # window_size=(8, 8) -> N = 64, batch B = 2.
    B, H, W = 2, 8, 8
    dim = 32
    num_heads = 4
    head_dim = dim // num_heads
    all_head_dim = num_heads * head_dim
    window_size = (H, W)
    N = H * W
    rel_sp_dim = 2 * window_size[0] - 1

    key = jax.random.PRNGKey(0)
    kx, kqkv, kproj, kbias, krh, krw = jax.random.split(key, 6)

    x = jax.random.normal(kx, (B, N, dim), dtype=jnp.float32)
    wqkv = 0.05 * jax.random.normal(kqkv, (3 * all_head_dim, dim), dtype=jnp.float32)
    wproj = 0.05 * jax.random.normal(kproj, (dim, all_head_dim), dtype=jnp.float32)
    bproj = 0.05 * jax.random.normal(kbias, (dim,), dtype=jnp.float32)
    rel_pos_h = 0.05 * jax.random.normal(krh, (rel_sp_dim, head_dim), dtype=jnp.float32)
    rel_pos_w = 0.05 * jax.random.normal(krw, (rel_sp_dim, head_dim), dtype=jnp.float32)

    out = attention_forward(x, wqkv, wproj, bproj, rel_pos_h, rel_pos_w,
                            window_size, num_heads, head_dim)
    out = jax.block_until_ready(out)

    ref = attention_reference(x, wqkv, wproj, bproj, rel_pos_h, rel_pos_w,
                              window_size, num_heads, head_dim)
    ref = jax.block_until_ready(ref)

    assert out.shape == (B, N, dim)
    assert jnp.allclose(out, ref, atol=2e-3, rtol=2e-3), (
        f"max abs err = {jnp.max(jnp.abs(out - ref))}")

    print("KERNEL_OK")
</pallas_src>

<mosaic_0001>
module attributes {stable_mosaic.version = 11 : i64} {
  func.func @attention_kernel(%arg0: i32, %arg1: memref<64x32xbf16, #tpu.memory_space<vmem>>, %arg2: memref<32x128xbf16, #tpu.memory_space<vmem>>, %arg3: memref<32x32xbf16, #tpu.memory_space<vmem>>, %arg4: memref<1x32xf32, #tpu.memory_space<vmem>>, %arg5: memref<64x128xbf16, #tpu.memory_space<vmem>>, %arg6: memref<128x64xbf16, #tpu.memory_space<vmem>>, %arg7: memref<64x32xf32, #tpu.memory_space<vmem>>, %arg8: memref<64x128xbf16, #tpu.memory_space<vmem>>) attributes {dimension_semantics = [#tpu.dimension_semantics<parallel>], iteration_bounds = array<i64: 2>, scalar_prefetch = 0 : i64, scratch_operands = 1 : i64, tpu.core_type = #tpu.core_type<tc>, window_params = [{transform_indices = @transform_0, window_bounds = array<i64: 64, 32>}, {pipeline_mode = #tpu.pipeline_mode<synchronous>, transform_indices = @transform_1, window_bounds = array<i64: 32, 128>}, {pipeline_mode = #tpu.pipeline_mode<synchronous>, transform_indices = @transform_2, window_bounds = array<i64: 32, 32>}, {pipeline_mode = #tpu.pipeline_mode<synchronous>, transform_indices = @transform_3, window_bounds = array<i64: 1, 32>}, {pipeline_mode = #tpu.pipeline_mode<synchronous>, transform_indices = @transform_4, window_bounds = array<i64: 64, 128>}, {pipeline_mode = #tpu.pipeline_mode<synchronous>, transform_indices = @transform_5, window_bounds = array<i64: 128, 64>}, {transform_indices = @transform_6, window_bounds = array<i64: 64, 32>}]} {
    %c0 = arith.constant 0 : index
    %c0_0 = arith.constant 0 : index
    %0 = vector.load %arg1[%c0, %c0_0] : memref<64x32xbf16, #tpu.memory_space<vmem>>, vector<64x32xbf16>
    %c0_1 = arith.constant 0 : index
    %c0_2 = arith.constant 0 : index
    %1 = vector.load %arg2[%c0_1, %c0_2] : memref<32x128xbf16, #tpu.memory_space<vmem>>, vector<32x128xbf16>
    %cst = arith.constant dense<0.000000e+00> : vector<64x128xf32>
    %2 = tpu.matmul %0, %1, %cst {dimension_numbers = #tpu.dot_dimension_numbers<[1], [0], [0], [1], [0, 0, 1, 1], [], []>} : vector<64x32xbf16>, vector<32x128xbf16>, vector<64x128xf32> -> vector<64x128xf32>
    %3 = arith.truncf %2 : vector<64x128xf32> to vector<64x128xbf16>
    %c0_3 = arith.constant 0 : index
    %c0_4 = arith.constant 0 : index
    %4 = vector.load %arg8[%c0_3, %c0_4] : memref<64x128xbf16, #tpu.memory_space<vmem>>, vector<64x128xbf16>
    tpu.vector_store %arg8[%c0_3, %c0_4], %3 {strides = array<i32>} : memref<64x128xbf16, #tpu.memory_space<vmem>>, vector<64x128xbf16>,
    %c0_5 = arith.constant 0 : index
    %c0_6 = arith.constant 0 : index
    %5 = vector.load %arg5[%c0_5, %c0_6] : memref<64x128xbf16, #tpu.memory_space<vmem>>, vector<64x128xbf16>
    %c0_7 = arith.constant 0 : index
    %c0_8 = arith.constant 0 : index
    %6 = vector.load %arg6[%c0_7, %c0_8] : memref<128x64xbf16, #tpu.memory_space<vmem>>, vector<128x64xbf16>
    %c0_9 = arith.constant 0 : index
    %c0_10 = arith.constant 0 : index
    %7 = vector.load %arg3[%c0_9, %c0_10] : memref<32x32xbf16, #tpu.memory_space<vmem>>, vector<32x32xbf16>
    %c0_11 = arith.constant 0 : index
    %c0_12 = arith.constant 0 : index
    %8 = vector.load %arg4[%c0_11, %c0_12] : memref<1x32xf32, #tpu.memory_space<vmem>>, vector<1x32xf32>
    %c0_13 = arith.constant 0 : index
    %c0_14 = arith.constant 0 : index
    %9 = vector.load %arg8[%c0_13, %c0_14] : memref<64x128xbf16, #tpu.memory_space<vmem>>, vector<64x8xbf16>
    %c0_15 = arith.constant 0 : index
    %c32 = arith.constant 32 : index
    %10 = vector.load %arg8[%c0_15, %c32] : memref<64x128xbf16, #tpu.memory_space<vmem>>, vector<64x8xbf16>
    %c0_16 = arith.constant 0 : index
    %c64 = arith.constant 64 : index
    %11 = vector.load %arg8[%c0_16, %c64] : memref<64x128xbf16, #tpu.memory_space<vmem>>, vector<64x8xbf16>
    %cst_17 = arith.constant dense<0.000000e+00> : vector<64x64xf32>
    %12 = tpu.matmul %9, %10, %cst_17 {dimension_numbers = #tpu.dot_dimension_numbers<[1], [1], [0], [0], [0, 0, 1, 0], [], []>} : vector<64x8xbf16>, vector<64x8xbf16>, vector<64x64xf32> -> vector<64x64xf32>
    %13 = tpu.concatenate %9, %9, %9, %9, %9, %9, %9, %9, %9, %9, %9, %9, %9, %9, %9, %9 in 1 : vector<64x8xbf16>, vector<64x8xbf16>, vector<64x8xbf16>, vector<64x8xbf16>, vector<64x8xbf16>, vector<64x8xbf16>, vector<64x8xbf16>, vector<64x8xbf16>, vector<64x8xbf16>, vector<64x8xbf16>, vector<64x8xbf16>, vector<64x8xbf16>, vector<64x8xbf16>, vector<64x8xbf16>, vector<64x8xbf16>, vector<64x8xbf16> -> vector<64x128xbf16>
    %14 = arith.mulf %13, %5 : vector<64x128xbf16>
    %cst_18 = arith.constant dense<0.000000e+00> : vector<64x64xf32>
    %15 = tpu.matmul %14, %6, %cst_18 {dimension_numbers = #tpu.dot_dimension_numbers<[1], [0], [0], [1], [0, 0, 1, 1], [], []>} : vector<64x128xbf16>, vector<128x64xbf16>, vector<64x64xf32> -> vector<64x64xf32>
    %16 = arith.addf %12, %15 : vector<64x64xf32>
    %cst_19 = arith.constant dense<0xFF800000> : vector<64xf32>
    %17 = vector.multi_reduction <maximumf>, %16, %cst_19 [1] : vector<64x64xf32> to vector<64xf32>
    %18 = vector.shape_cast %17 : vector<64xf32> to vector<64x1xf32>
    %19 = vector.broadcast %18 : vector<64x1xf32> to vector<64x64xf32>
    %20 = arith.subf %16, %19 : vector<64x64xf32>
    %21 = math.exp %20 : vector<64x64xf32>
    %cst_20 = arith.constant dense<0.000000e+00> : vector<64xf32>
    %22 = vector.multi_reduction <add>, %21, %cst_20 [1] : vector<64x64xf32> to vector<64xf32>
    %23 = vector.shape_cast %22 : vector<64xf32> to vector<64x1xf32>
    %24 = arith.truncf %21 : vector<64x64xf32> to vector<64x64xbf16>
    %cst_21 = arith.constant dense<0.000000e+00> : vector<64x8xf32>
    %25 = tpu.matmul %24, %11, %cst_21 {dimension_numbers = #tpu.dot_dimension_numbers<[1], [0], [0], [1], [0, 0, 1, 1], [], []>} : vector<64x64xbf16>, vector<64x8xbf16>, vector<64x8xf32> -> vector<64x8xf32>
    %26 = tpu.reciprocal %23 {approx = true} : vector<64x1xf32> -> vector<64x1xf32>
    %27 = vector.broadcast %26 : vector<64x1xf32> to vector<64x8xf32>
    %28 = arith.mulf %25, %27 : vector<64x8xf32>
    %29 = arith.truncf %28 : vector<64x8xf32> to vector<64x8xbf16>
    %c0_22 = arith.constant 0 : index
    %c8 = arith.constant 8 : index
    %30 = vector.load %arg8[%c0_22, %c8] : memref<64x128xbf16, #tpu.memory_space<vmem>>, vector<64x8xbf16>
    %c0_23 = arith.constant 0 : index
    %c40 = arith.constant 40 : index
    %31 = vector.load %arg8[%c0_23, %c40] : memref<64x128xbf16, #tpu.memory_space<vmem>>, vector<64x8xbf16>
    %c0_24 = arith.constant 0 : index
    %c72 = arith.constant 72 : index
    %32 = vector.load %arg8[%c0_24, %c72] : memref<64x128xbf16, #tpu.memory_space<vmem>>, vector<64x8xbf16>
    %cst_25 = arith.constant dense<0.000000e+00> : vector<64x64xf32>
    %33 = tpu.matmul %30, %31, %cst_25 {dimension_numbers = #tpu.dot_dimension_numbers<[1], [1], [0], [0], [0, 0, 1, 0], [], []>} : vector<64x8xbf16>, vector<64x8xbf16>, vector<64x64xf32> -> vector<64x64xf32>
    %34 = tpu.concatenate %30, %30, %30, %30, %30, %30, %30, %30, %30, %30, %30, %30, %30, %30, %30, %30 in 1 : vector<64x8xbf16>, vector<64x8xbf16>, vector<64x8xbf16>, vector<64x8xbf16>, vector<64x8xbf16>, vector<64x8xbf16>, vector<64x8xbf16>, vector<64x8xbf16>, vector<64x8xbf16>, vector<64x8xbf16>, vector<64x8xbf16>, vector<64x8xbf16>, vector<64x8xbf16>, vector<64x8xbf16>, vector<64x8xbf16>, vector<64x8xbf16> -> vector<64x128xbf16>
    %35 = arith.mulf %34, %5 : vector<64x128xbf16>
    %cst_26 = arith.constant dense<0.000000e+00> : vector<64x64xf32>
    %36 = tpu.matmul %35, %6, %cst_26 {dimension_numbers = #tpu.dot_dimension_numbers<[1], [0], [0], [1], [0, 0, 1, 1], [], []>} : vector<64x128xbf16>, vector<128x64xbf16>, vector<64x64xf32> -> vector<64x64xf32>
    %37 = arith.addf %33, %36 : vector<64x64xf32>
    %cst_27 = arith.constant dense<0xFF800000> : vector<64xf32>
    %38 = vector.multi_reduction <maximumf>, %37, %cst_27 [1] : vector<64x64xf32> to vector<64xf32>
    %39 = vector.shape_cast %38 : vector<64xf32> to vector<64x1xf32>
    %40 = vector.broadcast %39 : vector<64x1xf32> to vector<64x64xf32>
    %41 = arith.subf %37, %40 : vector<64x64xf32>
    %42 = math.exp %41 : vector<64x64xf32>
    %cst_28 = arith.constant dense<0.000000e+00> : vector<64xf32>
    %43 = vector.multi_reduction <add>, %42, %cst_28 [1] : vector<64x64xf32> to vector<64xf32>
    %44 = vector.shape_cast %43 : vector<64xf32> to vector<64x1xf32>
    %45 = arith.truncf %42 : vector<64x64xf32> to vector<64x64xbf16>
    %cst_29 = arith.constant dense<0.000000e+00> : vector<64x8xf32>
    %46 = tpu.matmul %45, %32, %cst_29 {dimension_numbers = #tpu.dot_dimension_numbers<[1], [0], [0], [1], [0, 0, 1, 1], [], []>} : vector<64x64xbf16>, vector<64x8xbf16>, vector<64x8xf32> -> vector<64x8xf32>
    %47 = tpu.reciprocal %44 {approx = true} : vector<64x1xf32> -> vector<64x1xf32>
    %48 = vector.broadcast %47 : vector<64x1xf32> to vector<64x8xf32>
    %49 = arith.mulf %46, %48 : vector<64x8xf32>
    %50 = arith.truncf %49 : vector<64x8xf32> to vector<64x8xbf16>
    %c0_30 = arith.constant 0 : index
    %c16 = arith.constant 16 : index
    %51 = vector.load %arg8[%c0_30, %c16] : memref<64x128xbf16, #tpu.memory_space<vmem>>, vector<64x8xbf16>
    %c0_31 = arith.constant 0 : index
    %c48 = arith.constant 48 : index
    %52 = vector.load %arg8[%c0_31, %c48] : memref<64x128xbf16, #tpu.memory_space<vmem>>, vector<64x8xbf16>
    %c0_32 = arith.constant 0 : index
    %c80 = arith.constant 80 : index
    %53 = vector.load %arg8[%c0_32, %c80] : memref<64x128xbf16, #tpu.memory_space<vmem>>, vector<64x8xbf16>
    %cst_33 = arith.constant dense<0.000000e+00> : vector<64x64xf32>
    %54 = tpu.matmul %51, %52, %cst_33 {dimension_numbers = #tpu.dot_dimension_numbers<[1], [1], [0], [0], [0, 0, 1, 0], [], []>} : vector<64x8xbf16>, vector<64x8xbf16>, vector<64x64xf32> -> vector<64x64xf32>
    %55 = tpu.concatenate %51, %51, %51, %51, %51, %51, %51, %51, %51, %51, %51, %51, %51, %51, %51, %51 in 1 : vector<64x8xbf16>, vector<64x8xbf16>, vector<64x8xbf16>, vector<64x8xbf16>, vector<64x8xbf16>, vector<64x8xbf16>, vector<64x8xbf16>, vector<64x8xbf16>, vector<64x8xbf16>, vector<64x8xbf16>, vector<64x8xbf16>, vector<64x8xbf16>, vector<64x8xbf16>, vector<64x8xbf16>, vector<64x8xbf16>, vector<64x8xbf16> -> vector<64x128xbf16>
    %56 = arith.mulf %55, %5 : vector<64x128xbf16>
    %cst_34 = arith.constant dense<0.000000e+00> : vector<64x64xf32>
    %57 = tpu.matmul %56, %6, %cst_34 {dimension_numbers = #tpu.dot_dimension_numbers<[1], [0], [0], [1], [0, 0, 1, 1], [], []>} : vector<64x128xbf16>, vector<128x64xbf16>, vector<64x64xf32> -> vector<64x64xf32>
    %58 = arith.addf %54, %57 : vector<64x64xf32>
    %cst_35 = arith.constant dense<0xFF800000> : vector<64xf32>
    %59 = vector.multi_reduction <maximumf>, %58, %cst_35 [1] : vector<64x64xf32> to vector<64xf32>
    %60 = vector.shape_cast %59 : vector<64xf32> to vector<64x1xf32>
    %61 = vector.broadcast %60 : vector<64x1xf32> to vector<64x64xf32>
    %62 = arith.subf %58, %61 : vector<64x64xf32>
    %63 = math.exp %62 : vector<64x64xf32>
    %cst_36 = arith.constant dense<0.000000e+00> : vector<64xf32>
    %64 = vector.multi_reduction <add>, %63, %cst_36 [1] : vector<64x64xf32> to vector<64xf32>
    %65 = vector.shape_cast %64 : vector<64xf32> to vector<64x1xf32>
    %66 = arith.truncf %63 : vector<64x64xf32> to vector<64x64xbf16>
    %cst_37 = arith.constant dense<0.000000e+00> : vector<64x8xf32>
    %67 = tpu.matmul %66, %53, %cst_37 {dimension_numbers = #tpu.dot_dimension_numbers<[1], [0], [0], [1], [0, 0, 1, 1], [], []>} : vector<64x64xbf16>, vector<64x8xbf16>, vector<64x8xf32> -> vector<64x8xf32>
    %68 = tpu.reciprocal %65 {approx = true} : vector<64x1xf32> -> vector<64x1xf32>
    %69 = vector.broadcast %68 : vector<64x1xf32> to vector<64x8xf32>
    %70 = arith.mulf %67, %69 : vector<64x8xf32>
    %71 = arith.truncf %70 : vector<64x8xf32> to vector<64x8xbf16>
    %c0_38 = arith.constant 0 : index
    %c24 = arith.constant 24 : index
    %72 = vector.load %arg8[%c0_38, %c24] : memref<64x128xbf16, #tpu.memory_space<vmem>>, vector<64x8xbf16>
    %c0_39 = arith.constant 0 : index
    %c56 = arith.constant 56 : index
    %73 = vector.load %arg8[%c0_39, %c56] : memref<64x128xbf16, #tpu.memory_space<vmem>>, vector<64x8xbf16>
    %c0_40 = arith.constant 0 : index
    %c88 = arith.constant 88 : index
    %74 = vector.load %arg8[%c0_40, %c88] : memref<64x128xbf16, #tpu.memory_space<vmem>>, vector<64x8xbf16>
    %cst_41 = arith.constant dense<0.000000e+00> : vector<64x64xf32>
    %75 = tpu.matmul %72, %73, %cst_41 {dimension_numbers = #tpu.dot_dimension_numbers<[1], [1], [0], [0], [0, 0, 1, 0], [], []>} : vector<64x8xbf16>, vector<64x8xbf16>, vector<64x64xf32> -> vector<64x64xf32>
    %76 = tpu.concatenate %72, %72, %72, %72, %72, %72, %72, %72, %72, %72, %72, %72, %72, %72, %72, %72 in 1 : vector<64x8xbf16>, vector<64x8xbf16>, vector<64x8xbf16>, vector<64x8xbf16>, vector<64x8xbf16>, vector<64x8xbf16>, vector<64x8xbf16>, vector<64x8xbf16>, vector<64x8xbf16>, vector<64x8xbf16>, vector<64x8xbf16>, vector<64x8xbf16>, vector<64x8xbf16>, vector<64x8xbf16>, vector<64x8xbf16>, vector<64x8xbf16> -> vector<64x128xbf16>
    %77 = arith.mulf %76, %5 : vector<64x128xbf16>
    %cst_42 = arith.constant dense<0.000000e+00> : vector<64x64xf32>
    %78 = tpu.matmul %77, %6, %cst_42 {dimension_numbers = #tpu.dot_dimension_numbers<[1], [0], [0], [1], [0, 0, 1, 1], [], []>} : vector<64x128xbf16>, vector<128x64xbf16>, vector<64x64xf32> -> vector<64x64xf32>
    %79 = arith.addf %75, %78 : vector<64x64xf32>
    %cst_43 = arith.constant dense<0xFF800000> : vector<64xf32>
    %80 = vector.multi_reduction <maximumf>, %79, %cst_43 [1] : vector<64x64xf32> to vector<64xf32>
    %81 = vector.shape_cast %80 : vector<64xf32> to vector<64x1xf32>
    %82 = vector.broadcast %81 : vector<64x1xf32> to vector<64x64xf32>
    %83 = arith.subf %79, %82 : vector<64x64xf32>
    %84 = math.exp %83 : vector<64x64xf32>
    %cst_44 = arith.constant dense<0.000000e+00> : vector<64xf32>
    %85 = vector.multi_reduction <add>, %84, %cst_44 [1] : vector<64x64xf32> to vector<64xf32>
    %86 = vector.shape_cast %85 : vector<64xf32> to vector<64x1xf32>
    %87 = arith.truncf %84 : vector<64x64xf32> to vector<64x64xbf16>
    %cst_45 = arith.constant dense<0.000000e+00> : vector<64x8xf32>
    %88 = tpu.matmul %87, %74, %cst_45 {dimension_numbers = #tpu.dot_dimension_numbers<[1], [0], [0], [1], [0, 0, 1, 1], [], []>} : vector<64x64xbf16>, vector<64x8xbf16>, vector<64x8xf32> -> vector<64x8xf32>
    %89 = tpu.reciprocal %86 {approx = true} : vector<64x1xf32> -> vector<64x1xf32>
    %90 = vector.broadcast %89 : vector<64x1xf32> to vector<64x8xf32>
    %91 = arith.mulf %88, %90 : vector<64x8xf32>
    %92 = arith.truncf %91 : vector<64x8xf32> to vector<64x8xbf16>
    %93 = tpu.concatenate %29, %50, %71, %92 in 1 : vector<64x8xbf16>, vector<64x8xbf16>, vector<64x8xbf16>, vector<64x8xbf16> -> vector<64x32xbf16>
    %cst_46 = arith.constant dense<0.000000e+00> : vector<64x32xf32>
    %94 = tpu.matmul %93, %7, %cst_46 {dimension_numbers = #tpu.dot_dimension_numbers<[1], [0], [0], [1], [0, 0, 1, 1], [], []>} : vector<64x32xbf16>, vector<32x32xbf16>, vector<64x32xf32> -> vector<64x32xf32>
    %95 = vector.broadcast %8 : vector<1x32xf32> to vector<64x32xf32>
    %96 = arith.addf %94, %95 : vector<64x32xf32>
    %c0_47 = arith.constant 0 : index
    %c0_48 = arith.constant 0 : index
    %97 = vector.load %arg7[%c0_47, %c0_48] : memref<64x32xf32, #tpu.memory_space<vmem>>, vector<64x32xf32>
    tpu.vector_store %arg7[%c0_47, %c0_48], %96 {strides = array<i32>} : memref<64x32xf32, #tpu.memory_space<vmem>>, vector<64x32xf32>,
    return
  }
  func.func @transform_0(%arg0: i32) -> (i32, i32) {
    %c0_i32 = arith.constant 0 : i32
    %c0_i32_0 = arith.constant 0 : i32
    return %arg0, %c0_i32 : i32, i32
  }
  func.func @transform_1(%arg0: i32) -> (i32, i32) {
    %c0_i32 = arith.constant 0 : i32
    %c0_i32_0 = arith.constant 0 : i32
    %c0_i32_1 = arith.constant 0 : i32
    return %c0_i32, %c0_i32_0 : i32, i32
  }
  func.func @transform_2(%arg0: i32) -> (i32, i32) {
    %c0_i32 = arith.constant 0 : i32
    %c0_i32_0 = arith.constant 0 : i32
    %c0_i32_1 = arith.constant 0 : i32
    return %c0_i32, %c0_i32_0 : i32, i32
  }
  func.func @transform_3(%arg0: i32) -> (i32, i32) {
    %c0_i32 = arith.constant 0 : i32
    %c0_i32_0 = arith.constant 0 : i32
    %c0_i32_1 = arith.constant 0 : i32
    return %c0_i32, %c0_i32_0 : i32, i32
  }
  func.func @transform_4(%arg0: i32) -> (i32, i32) {
    %c0_i32 = arith.constant 0 : i32
    %c0_i32_0 = arith.constant 0 : i32
    %c0_i32_1 = arith.constant 0 : i32
    return %c0_i32, %c0_i32_0 : i32, i32
  }
  func.func @transform_5(%arg0: i32) -> (i32, i32) {
    %c0_i32 = arith.constant 0 : i32
    %c0_i32_0 = arith.constant 0 : i32
    %c0_i32_1 = arith.constant 0 : i32
    return %c0_i32, %c0_i32_0 : i32, i32
  }
  func.func @transform_6(%arg0: i32) -> (i32, i32) {
    %c0_i32 = arith.constant 0 : i32
    %c0_i32_0 = arith.constant 0 : i32
    return %arg0, %c0_i32 : i32, i32
  }
}

</mosaic_0001>

<bundles_post_ra>
// kernel: tpu_custom_call.1
= control target key start
LH: loop header
LB: loop body
LE: loop exit
PB: predicated region body
PF: predicated region fallthrough
CT: control target
= control target key end

     0   :  { %s3207_s21 = smov 0   ;;  %s4696_s0 = inlined_call_operand.vmem [shape: bf16[128,32], index: 0, kind: input, shape index: {}]   ;;  %s4697_s1 = inlined_call_operand.vmem [shape: bf16[32,128], index: 1, kind: input, shape index: {}]   ;;  %s4698_s2 = inlined_call_operand.vmem [shape: bf16[32,32], index: 2, kind: input, shape index: {}]   ;;  %s4699_s3 = inlined_call_operand.vmem [shape: f32[1,32], index: 3, kind: input, shape index: {}]   ;;  %s4700_s4 = inlined_call_operand.vmem [shape: bf16[64,128], index: 4, kind: input, shape index: {}]   ;;  %s4701_s5 = inlined_call_operand.vmem [shape: bf16[128,64], index: 5, kind: input, shape index: {}]   ;;  %s4702_s6 = inlined_call_operand.vmem [shape: f32[128,32], index: 6, kind: output, shape index: {}]  }
   0x1 LB: > { %s2476_s22 = sadd.s32 4294967295, %s3155_s21   ;;  %p2480_p0 = scmp.ge.s32.totalorder %s3155_s21, 1  ;;  %s3155_s21 = sphi %s3207_s21, %s16_s21  }
   0x2   : > { %p213_p1 = scmp.lt.s32.totalorder %s3155_s21, 3 }
   0x4   : > { %p214_p2 = pnand %p2480_p0, %p213_p1 }
   0x6   : > { %217 = sbr.rel (%p214_p2) target bundleno = 2775 (0xad7), region = 44 }
   0xd   : > { %v2991_v0 = vld [vmem:[%s4697_s1] sm:$0xff]   ;;  %s2481_s25 = sshll.u32 %s2476_s22, 3  ;;  %v2992_v1 = vld [vmem:[%s4697_s1 + $0x8] sm:$0xff]   ;;  %vm300_vm0 = vcmask 261120   ;;  %s3157_s10 = smov 16   ;;  %v3264_v20 = vld [vmem:[%s4701_s5 + $0x10] sm:$0xff]  }
   0xe   : > { %p244_p3 = scmp.lt.s32.totalorder %s2481_s25, 15  ;;  %2672 = vmatprep.subr.bf16.mxu0 %v2991_v0  ;;  %v3238_v12 = vld [vmem:[%s4701_s5] sm:$0xff]   ;;  %s3158_s11 = smov 8   ;;  %v3249_v14 = vld [vmem:[%s4701_s5 + $0x8] sm:$0xff]   ;;  %4781 = vst [vmem:[#allocation5_spill] sm:$0xff] %v3264_v20  ;;  %v3275_v21 = vld [vmem:[%s4701_s5 + $0x18] sm:$0xff]  }
   0xf   : > { %2673 = vmatpush3.bf16.msra.mxu0 %v2991_v0  ;;  %2684 = vmatprep.subr.bf16.mxu1 %v3238_v12  ;;  %4780 = vst [vmem:[#allocation4_spill] sm:$0xff] %v3249_v14  ;;  %s3159_s14 = smov 24   ;;  %s3160_s17 = smov 32   ;;  %4782 = vst [vmem:[#allocation6_spill] sm:$0xff] %v3275_v21  ;;  %v3286_v22 = vld [vmem:[%s4701_s5 + $0x20] sm:$0xff]   ;;  %v3297_v23 = vld [vmem:[%s4701_s5 + $0x28] sm:$0xff]  }
  0x10   : > { %s4916_s25 = smov (!%p244_p3, %s2481_s25), 15  ;;  %2674 = vmatprep.subr.bf16.mxu0 %v2992_v1  ;;  %2685 = vmatpush3.bf16.msra.mxu1 %v3238_v12  ;;  %s3161_s20 = smov 40   ;;  %4783 = vst [vmem:[#allocation7_spill] sm:$0xff] %v3286_v22  ;;  %4784 = vst [vmem:[#allocation8_spill] sm:$0xff] %v3297_v23  ;;  %v3308_v24 = vld [vmem:[%s4701_s5 + $0x30] sm:$0xff]   ;;  %v3319_v25 = vld [vmem:[%s4701_s5 + $0x38] sm:$0xff]  }
  0x11   : > { %s2482_s28 = sshll.u32 %s4916_s25, 2  ;;  %2686 = vmatprep.subr.bf16.mxu1 %v3249_v14  ;;  %s3162_s24 = smov 48   ;;  %4785 = vst [vmem:[#allocation9_spill] sm:$0xff] %v3308_v24  ;;  %4786 = vst [vmem:[#allocation10_spill] sm:$0xff] %v3319_v25  ;;  %vm543_vm1 = vcmask 64512   ;;  %vm556_vm2 = vcmask 130048  }
  0x12   : > { %s247_s7 = scalar_lea.vmem %s4696_s0, %s2482_s28  ;;  %s3163_s28 = smov 56   ;;  %vm565_vm3 = vcmask 195584   ;;  %vm582_vm4 = vcmask 326656   ;;  %vm591_vm5 = vcmask 392192   ;;  %vm600_vm6 = vcmask 457728  }
  0x13   : > { %2675 = vmatpush3.bf16.msra.mxu0 %v2992_v1  ;;  %v2993_v2 = vld [vmem:[%s247_s7] sm:$0xff]   ;;  %v2994_v3 = vld [vmem:[%s247_s7 + $0x8] sm:$0xff]   ;;  %v2995_v4 = vld [vmem:[%s247_s7 + $0x10] sm:$0xff]   ;;  %s3165_s12 = smov 72   ;;  %s3166_s13 = smov 80   ;;  %vm609_vm7 = vcmask 523264  }
  0x14   : > { %2676 = vmatprep.mubr.msk.bf16.mxu0 %vm300_vm0, %v2993_v2  ;;  %v2996_v5 = vld [vmem:[%s247_s7 + $0x18] sm:$0xff]   ;;  %2687 = vmatpush3.bf16.msra.mxu1 %v3249_v14  ;;  %s3164_s7 = smov 64   ;;  %s3167_s15 = smov 88   ;;  %vm618_vm8 = vcmask 588800   ;;  %vm627_vm9 = vcmask 654336   ;;  %vm636_vm10 = vcmask 719872  }
  0x15   : > { %2688 = vmatprep.subr.bf16.mxu1 %v3264_v20  ;;  %s3168_s16 = smov 96   ;;  %s3169_s18 = smov 104   ;;  %vm645_vm11 = vcmask 785408   ;;  %vm654_vm12 = vcmask 850944   ;;  %vm663_vm13 = vcmask 916480   ;;  %vm672_vm14 = vcmask 982016  }
  0x16   : > { %2677 = vmatmul.mubr.msk.bf16.vlgmr.msra.gmra.mrb[0].mxu0 %vm300_vm0, %v2994_v3  ;;  %s3170_s19 = smov 112   ;;  %s3171_s22 = smov 120  }
  0x17   : > { %2680 = vmatprep.mubr.msk.bf16.mxu0 %vm300_vm0, %v2995_v4 }
  0x18   : > { %2689 = vmatpush3.bf16.msra.mxu1 %v3264_v20 }
  0x19   : > { %2690 = vmatprep.subr.bf16.mxu1 %v3275_v21 }
  0x1c   : > { %2691 = vmatpush3.bf16.msra.mxu1 %v3275_v21 }
  0x1d   : > { %2692 = vmatprep.subr.bf16.mxu1 %v3286_v22 }
  0x1e   : > { %2681 = vmatmul.mubr.msk.bf16.gmra.mrb[4].mxu0 %vm300_vm0, %v2996_v5 }
  0x20   : > { %2693 = vmatpush3.bf16.msra.mxu1 %v3286_v22 }
  0x21   : > { %2694 = vmatprep.subr.bf16.mxu1 %v3297_v23 }
  0x24   : > { %2695 = vmatpush3.bf16.msra.mxu1 %v3297_v23 }
  0x25   : > { %2696 = vmatprep.subr.bf16.mxu1 %v3308_v24 }
  0x28   : > { %2697 = vmatpush3.bf16.msra.mxu1 %v3308_v24 }
  0x29   : > { %2698 = vmatprep.subr.bf16.mxu1 %v3319_v25 }
  0x2c   : > { %2699 = vmatpush3.bf16.msra.mxu1 %v3319_v25 }
  0xe9   : > { %v2678_v6 = vpop.f32.mrb[0].mxu0 }
  0xea   : > { %v347_v7 = vpop.f32.mrb[1].mxu0 }
  0xeb   : > { %v2679_v8 = vpop.f32.mrb[2].mxu0 }
  0xec   : > { %v3231_v9 = vpack.c.bf16 %v2679_v8, %v2678_v6  ;;  %v350_v10 = vpop.f32.mrb[3].mxu0 }
  0xed   : > { %v3233_v11 = vpack.c.bf16 %v350_v10, %v347_v7 }
  0xee   : > { %433 = vrot.lane.b32.xlu1 %v3231_v9, %s3157_s10  ;;  %425 = vrot.lane.b32.xlu0 %v3231_v9, %s3158_s11 }
  0xef   : > { %4779 = vst [vmem:[#allocation3_spill] sm:$0xff] %v3233_v11 }
  0xf1   : > { %v2682_v13 = vpop.f32.mrb[4].mxu0 }
  0xf2   : > { %441 = vrot.lane.b32.xlu1 %v3231_v9, %s3159_s14  ;;  %423 = vrot.lane.b32.xlu0 %v3233_v11, %s3158_s11  ;;  %v363_v15 = vpop.f32.mrb[5].mxu0 }
  0xf3   : > { %v2683_v16 = vpop.f32.mrb[6].mxu0 }
  0xf4   : > { %v3256_v17 = vpack.c.bf16 %v2683_v16, %v2682_v13  ;;  %v366_v18 = vpop.f32.mrb[7].mxu0 }
  0xf5   : > { %v3259_v19 = vpack.c.bf16 %v366_v18, %v363_v15 }
  0xf6   : > { %449 = vrot.lane.b32.xlu1 %v3231_v9, %s3160_s17  ;;  %439 = vrot.lane.b32.xlu0 %v3233_v11, %s3159_s14 }
  0xfa   : > { %457 = vrot.lane.b32.xlu1 %v3231_v9, %s3161_s20  ;;  %447 = vrot.lane.b32.xlu0 %v3233_v11, %s3160_s17 }
  0xfe   : > { %465 = vrot.lane.b32.xlu1 %v3231_v9, %s3162_s24  ;;  %455 = vrot.lane.b32.xlu0 %v3233_v11, %s3161_s20 }
 0x102   : > { %473 = vrot.lane.b32.xlu1 %v3231_v9, %s3163_s28  ;;  %463 = vrot.lane.b32.xlu0 %v3233_v11, %s3162_s24 }
 0x106   : > { %481 = vrot.lane.b32.xlu1 %v3231_v9, %s3164_s7  ;;  %471 = vrot.lane.b32.xlu0 %v3233_v11, %s3163_s28 }
 0x10a   : > { %489 = vrot.lane.b32.xlu1 %v3231_v9, %s3165_s12  ;;  %479 = vrot.lane.b32.xlu0 %v3233_v11, %s3164_s7 }
 0x10e   : > { %497 = vrot.lane.b32.xlu1 %v3231_v9, %s3166_s13  ;;  %487 = vrot.lane.b32.xlu0 %v3233_v11, %s3165_s12 }
 0x112   : > { %505 = vrot.lane.b32.xlu1 %v3231_v9, %s3167_s15  ;;  %495 = vrot.lane.b32.xlu0 %v3233_v11, %s3166_s13 }
 0x116   : > { %513 = vrot.lane.b32.xlu1 %v3231_v9, %s3168_s16  ;;  %503 = vrot.lane.b32.xlu0 %v3233_v11, %s3167_s15 }
 0x11a   : > { %521 = vrot.lane.b32.xlu1 %v3231_v9, %s3169_s18  ;;  %511 = vrot.lane.b32.xlu0 %v3233_v11, %s3168_s16 }
 0x11e   : > { %529 = vrot.lane.b32.xlu1 %v3231_v9, %s3170_s19  ;;  %519 = vrot.lane.b32.xlu0 %v3233_v11, %s3169_s18 }
 0x122   : > { %537 = vrot.lane.b32.xlu1 %v3231_v9, %s3171_s22  ;;  %527 = vrot.lane.b32.xlu0 %v3233_v11, %s3170_s19 }
 0x126   : > { %431 = vrot.lane.b32.xlu1 %v3233_v11, %s3157_s10  ;;  %535 = vrot.lane.b32.xlu0 %v3233_v11, %s3171_s22 }
 0x12a   : > { %509 = vrot.lane.b32.xlu0 %v3256_v17, %s3167_s15  ;;  %429 = vrot.lane.b32.xlu1 %v3256_v17, %s3158_s11 }
 0x12e   : > { %437 = vrot.lane.b32.xlu1 %v3256_v17, %s3157_s10  ;;  %427 = vrot.lane.b32.xlu0 %v3259_v19, %s3158_s11 }
 0x132   : > { %445 = vrot.lane.b32.xlu1 %v3256_v17, %s3159_s14  ;;  %435 = vrot.lane.b32.xlu0 %v3259_v19, %s3157_s10 }
 0x136   : > { %453 = vrot.lane.b32.xlu1 %v3256_v17, %s3160_s17  ;;  %443 = vrot.lane.b32.xlu0 %v3259_v19, %s3159_s14 }
 0x13a   : > { %461 = vrot.lane.b32.xlu1 %v3256_v17, %s3161_s20  ;;  %451 = vrot.lane.b32.xlu0 %v3259_v19, %s3160_s17 }
 0x13e   : > { %469 = vrot.lane.b32.xlu1 %v3256_v17, %s3162_s24  ;;  %459 = vrot.lane.b32.xlu0 %v3259_v19, %s3161_s20 }
 0x142   : > { %477 = vrot.lane.b32.xlu1 %v3256_v17, %s3163_s28  ;;  %467 = vrot.lane.b32.xlu0 %v3259_v19, %s3162_s24 }
 0x146   : > { %485 = vrot.lane.b32.xlu1 %v3256_v17, %s3164_s7  ;;  %475 = vrot.lane.b32.xlu0 %v3259_v19, %s3163_s28 }
 0x14a   : > { %493 = vrot.lane.b32.xlu1 %v3256_v17, %s3165_s12  ;;  %483 = vrot.lane.b32.xlu0 %v3259_v19, %s3164_s7 }
 0x14e   : > { %501 = vrot.lane.b32.xlu1 %v3256_v17, %s3166_s13  ;;  %491 = vrot.lane.b32.xlu0 %v3259_v19, %s3165_s12 }
 0x152   : > { %517 = vrot.lane.b32.xlu1 %v3256_v17, %s3168_s16  ;;  %499 = vrot.lane.b32.xlu0 %v3259_v19, %s3166_s13 }
 0x156   : > { %525 = vrot.lane.b32.xlu1 %v3256_v17, %s3169_s18  ;;  %507 = vrot.lane.b32.xlu0 %v3259_v19, %s3167_s15 }
 0x15a   : > { %515 = vrot.lane.b32.xlu1 %v3259_v19, %s3168_s16  ;;  %523 = vrot.lane.b32.xlu0 %v3259_v19, %s3169_s18 }
 0x15e   : > { %533 = vrot.lane.b32.xlu1 %v3256_v17, %s3170_s19  ;;  %531 = vrot.lane.b32.xlu0 %v3259_v19, %s3170_s19 }
 0x160   : > { %v3411_v26 = vpop.permute.xlu1 %433  ;;  %v3413_v27 = vpop.permute.xlu0 %425 }
 0x161   : > { %v549_v54 = vsel %vm543_vm1, %v3231_v9, %v3413_v27 }
 0x162   : > { %541 = vrot.lane.b32.xlu1 %v3256_v17, %s3171_s22  ;;  %539 = vrot.lane.b32.xlu0 %v3259_v19, %s3171_s22  ;;  %v560_v59 = vsel %vm556_vm2, %v549_v54, %v3411_v26 }
 0x164   : > { %v3419_v28 = vpop.permute.xlu1 %441  ;;  %v3421_v29 = vpop.permute.xlu0 %423 }
 0x165   : > { %4787 = vst [vmem:[#allocation11_spill] sm:$0xff] %v3419_v28  ;;  %4788 = vst [vmem:[#allocation12_spill] sm:$0xff] %v3421_v29  ;;  %v546_v55 = vsel %vm543_vm1, %v3233_v11, %v3421_v29  ;;  %v569_v61 = vsel %vm565_vm3, %v560_v59, %v3419_v28 }
 0x168   : > { %v3423_v30 = vpop.permute.xlu1 %449  ;;  %v3425_v31 = vpop.permute.xlu0 %439 }
 0x169   : > { %4789 = vst [vmem:[#allocation13_spill] sm:$0xff] %v3423_v30  ;;  %4790 = vst [vmem:[#allocation14_spill] sm:$0xff] %v3425_v31  ;;  %v577_v63 = vsel %vm300_vm0, %v569_v61, %v3423_v30 }
 0x16c   : > { %v3427_v32 = vpop.permute.xlu1 %457  ;;  %v3429_v33 = vpop.permute.xlu0 %447 }
 0x16d   : > { %4791 = vst [vmem:[#allocation15_spill] sm:$0xff] %v3427_v32  ;;  %v586_v3 = vsel %vm582_vm4, %v577_v63, %v3427_v32 }
 0x170   : > { %v3431_v34 = vpop.permute.xlu1 %465  ;;  %v3433_v35 = vpop.permute.xlu0 %455 }
 0x171   : > { %4792 = vst [vmem:[#allocation16_spill] sm:$0xff] %v3431_v34  ;;  %v595_v5 = vsel %vm591_vm5, %v586_v3, %v3431_v34 }
 0x174   : > { %v3435_v36 = vpop.permute.xlu1 %473  ;;  %v3437_v37 = vpop.permute.xlu0 %463 }
 0x175   : > { %v604_v6 = vsel %vm600_vm6, %v595_v5, %v3435_v36 }
 0x178   : > { %v3439_v38 = vpop.permute.xlu1 %481  ;;  %v3441_v39 = vpop.permute.xlu0 %471 }
 0x179   : > { %4793 = vst [vmem:[#allocation17_spill] sm:$0xff] %v3439_v38  ;;  %v613_v8 = vsel %vm609_vm7, %v604_v6, %v3439_v38  ;;  %v3557_v6 = vld [vmem:[%s4700_s4 + $0x8] sm:$0xff]  }
 0x17a   : > { %4808 = vst [vmem:[#allocation32_spill] sm:$0xff] %v3557_v6 }
 0x17c   : > { %v3443_v40 = vpop.permute.xlu1 %489  ;;  %v3445_v41 = vpop.permute.xlu0 %479 }
 0x17d   : > { %4794 = vst [vmem:[#allocation18_spill] sm:$0xff] %v3443_v40  ;;  %2724 = vmatprep.subr.bf16.mxu0 %v3445_v41  ;;  %v622_v16 = vsel %vm618_vm8, %v613_v8, %v3443_v40 }
 0x17e   : > { %2725 = vmatpush3.bf16.msra.mxu0 %v3445_v41 }
 0x17f   : > { %2726 = vmatprep.subr.bf16.mxu0 %v3439_v38 }
 0x180   : > { %v3450_v42 = vpop.permute.xlu1 %497  ;;  %v3452_v43 = vpop.permute.xlu0 %487 }
 0x181   : > { %4795 = vst [vmem:[#allocation19_spill] sm:$0xff] %v3450_v42  ;;  %v631_v18 = vsel %vm627_vm9, %v622_v16, %v3450_v42 }
 0x182   : > { %2727 = vmatpush3.bf16.msra.mxu0 %v3439_v38 }
 0x184   : > { %v3455_v44 = vpop.permute.xlu1 %505  ;;  %v3457_v45 = vpop.permute.xlu0 %495 }
 0x185   : > { %4796 = vst [vmem:[#allocation20_spill] sm:$0xff] %v3455_v44  ;;  %4797 = vst [vmem:[#allocation21_spill] sm:$0xff] %v3457_v45 }
 0x188   : > { %v3459_v46 = vpop.permute.xlu1 %513  ;;  %v3461_v47 = vpop.permute.xlu0 %503 }
 0x189   : > { %4798 = vst [vmem:[#allocation22_spill] sm:$0xff] %v3459_v46  ;;  %4799 = vst [vmem:[#allocation23_spill] sm:$0xff] %v3461_v47 }
 0x18c   : > { %v3463_v48 = vpop.permute.xlu1 %521  ;;  %v3465_v49 = vpop.permute.xlu0 %511 }
 0x18d   : > { %4800 = vst [vmem:[#allocation24_spill] sm:$0xff] %v3463_v48  ;;  %4801 = vst [vmem:[#allocation25_spill] sm:$0xff] %v3465_v49  ;;  %2952 = vmatprep.subr.msk.bf16.mxu1 %vm543_vm1, %v3465_v49 }
 0x190   : > { %v3469_v50 = vpop.permute.xlu1 %529  ;;  %v3471_v51 = vpop.permute.xlu0 %519 }
 0x191   : > { %4802 = vst [vmem:[#allocation26_spill] sm:$0xff] %v3469_v50  ;;  %4803 = vst [vmem:[#allocation27_spill] sm:$0xff] %v3471_v51 }
 0x194   : > { %v3473_v52 = vpop.permute.xlu1 %537  ;;  %v3475_v53 = vpop.permute.xlu0 %527 }
 0x195   : > { %4804 = vst [vmem:[#allocation28_spill] sm:$0xff] %v3475_v53 }
 0x198   : > { %v3483_v56 = vpop.permute.xlu1 %431  ;;  %v3485_v57 = vpop.permute.xlu0 %535 }
 0x199   : > { %4805 = vst [vmem:[#allocation29_spill] sm:$0xff] %v3483_v56  ;;  %4806 = vst [vmem:[#allocation30_spill] sm:$0xff] %v3485_v57  ;;  %v558_v58 = vsel %vm556_vm2, %v546_v55, %v3483_v56 }
 0x19a   : > { %v567_v60 = vsel %vm565_vm3, %v558_v58, %v3425_v31  ;;  %v640_v58 = vsel %vm636_vm10, %v631_v18, %v3455_v44 }
 0x19b   : > { %v575_v62 = vsel %vm300_vm0, %v567_v60, %v3429_v33 }
 0x19c   : > { %v584_v0 = vsel %vm582_vm4, %v575_v62, %v3433_v35  ;;  %v3501_v1 = vpop.permute.xlu0 %509  ;;  %v3503_v2 = vpop.permute.xlu1 %429  ;;  %v649_v62 = vsel %vm645_vm11, %v640_v58, %v3459_v46  ;;  %v834_v58 = vsel %vm543_vm1, %v3465_v49, 0 }
 0x19d   : > { %v593_v4 = vsel %vm591_vm5, %v584_v0, %v3437_v37  ;;  %v3546_v0 = vld [vmem:[%s4700_s4] sm:$0xff]   ;;  %v658_v3 = vsel %vm654_vm12, %v649_v62, %v3463_v48  ;;  %v555_v25 = vsel %vm543_vm1, %v3256_v17, %v3503_v2 }
 0x19e   : > { %v602_v7 = vsel %vm600_vm6, %v593_v4, %v3441_v39  ;;  %4807 = vst [vmem:[#allocation31_spill] sm:$0xff] %v3546_v0  ;;  %v667_v5 = vsel %vm663_vm13, %v658_v3, %v3469_v50 }
 0x19f   : > { %v611_v15 = vsel %vm609_vm7, %v602_v7, %v3445_v41  ;;  %v677_v8 = vsel %vm672_vm14, %v667_v5, %v3473_v52 }
 0x1a0   : > { %v3517_v10 = vpop.permute.xlu1 %437  ;;  %v3519_v13 = vpop.permute.xlu0 %427  ;;  %v620_v54 = vsel %vm618_vm8, %v611_v15, %v3452_v43 }
 0x1a1   : > { %v629_v55 = vsel %vm627_vm9, %v620_v54, %v3457_v45  ;;  %v552_v48 = vsel %vm543_vm1, %v3259_v19, %v3519_v13  ;;  %v564_v24 = vsel %vm556_vm2, %v555_v25, %v3517_v10 }
 0x1a2   : > { %v638_v61 = vsel %vm636_vm10, %v629_v55, %v3461_v47  ;;  %v710_v55 = vmul.bf16 %v3557_v6, %v677_v8 }
 0x1a3   : > { %v647_v63 = vsel %vm645_vm11, %v638_v61, %v3465_v49 }
 0x1a4   : > { %v3533_v59 = vpop.permute.xlu1 %445  ;;  %v3535_v60 = vpop.permute.xlu0 %435  ;;  %v656_v4 = vsel %vm654_vm12, %v647_v63, %v3471_v51 }
 0x1a5   : > { %v665_v7 = vsel %vm663_vm13, %v656_v4, %v3475_v53  ;;  %v836_v4 = vsel %vm543_vm1, %v3459_v46, 0  ;;  %v573_v44 = vsel %vm565_vm3, %v564_v24, %v3533_v59 }
 0x1a6   : > { %v674_v18 = vsel %vm672_vm14, %v665_v7, %v3485_v57 }
 0x1a7   : > { %v709_v54 = vmul.bf16 %v3546_v0, %v674_v18 }
 0x1a8   : > { %v3563_v15 = vpop.permute.xlu1 %453  ;;  %v3565_v16 = vpop.permute.xlu0 %443 }
 0x1a9   : > { %2700 = vmatprep.mubr.bf16.mxu1 %v709_v54  ;;  %v581_v42 = vsel %vm300_vm0, %v573_v44, %v3563_v15 }
 0x1aa   : > { %2701 = vmatmul.mubr.bf16.vlgmr.msra.gmra.mrb[0].mxu1 %v710_v55 }
 0x1ab   : > { %2709 = vmatpush3.bf16.xpose.msra.mxu1 %v834_v58 }
 0x1ac   : > { %v3573_v61 = vpop.permute.xlu1 %461  ;;  %v3575_v62 = vpop.permute.xlu0 %451  ;;  %2953 = vmatprep.subr.msk.bf16.mxu1 %vm543_vm1, %v3459_v46  ;;  %v562_v46 = vsel %vm556_vm2, %v552_v48, %v3535_v60 }
 0x1ad   : > { %v571_v23 = vsel %vm565_vm3, %v562_v46, %v3565_v16  ;;  %v590_v25 = vsel %vm582_vm4, %v581_v42, %v3573_v61 }
 0x1ae   : > { %v579_v22 = vsel %vm300_vm0, %v571_v23, %v3575_v62 }
 0x1b0   : > { %v3579_v63 = vpop.permute.xlu1 %469  ;;  %v3581_v3 = vpop.permute.xlu0 %459 }
 0x1b1   : > { %v588_v48 = vsel %vm582_vm4, %v579_v22, %v3581_v3  ;;  %v599_v24 = vsel %vm591_vm5, %v590_v25, %v3579_v63 }
 0x1b3   : > { %2711 = vmatpush3.bf16.xpose.msra.mxu1 %v836_v4 }
 0x1b4   : > { %v3585_v5 = vpop.permute.xlu1 %477  ;;  %v3587_v7 = vpop.permute.xlu0 %467 }
 0x1b5   : > { %v597_v46 = vsel %vm591_vm5, %v588_v48, %v3587_v7  ;;  %v608_v44 = vsel %vm600_vm6, %v599_v24, %v3585_v5 }
 0x1b8   : > { %v3589_v8 = vpop.permute.xlu1 %485  ;;  %v3591_v18 = vpop.permute.xlu0 %475 }
 0x1b9   : > { %v606_v23 = vsel %vm600_vm6, %v597_v46, %v3591_v18  ;;  %v617_v38 = vsel %vm609_vm7, %v608_v44, %v3589_v8 }
 0x1bc   : > { %v3593_v54 = vpop.permute.xlu1 %493  ;;  %v3595_v55 = vpop.permute.xlu0 %483 }
 0x1bd   : > { %4809 = vst [vmem:[#allocation33_spill] sm:$0xff] %v3593_v54  ;;  %2728 = vmatprep.subr.bf16.mxu0 %v3595_v55  ;;  %v615_v42 = vsel %vm609_vm7, %v606_v23, %v3595_v55  ;;  %v626_v25 = vsel %vm618_vm8, %v617_v38, %v3593_v54 }
 0x1be   : > { %2729 = vmatpush3.bf16.msra.mxu0 %v3595_v55 }
 0x1bf   : > { %2730 = vmatprep.subr.bf16.mxu0 %v3589_v8 }
 0x1c0   : > { %v3600_v58 = vpop.permute.xlu1 %501  ;;  %v3602_v6 = vpop.permute.xlu0 %491 }
 0x1c1   : > { %4810 = vst [vmem:[#allocation34_spill] sm:$0xff] %v3602_v6  ;;  %v624_v48 = vsel %vm618_vm8, %v615_v42, %v3602_v6  ;;  %v635_v46 = vsel %vm627_vm9, %v626_v25, %v3600_v58 }
 0x1c2   : > { %2731 = vmatpush3.bf16.msra.mxu0 %v3589_v8  ;;  %v644_v25 = vsel %vm636_vm10, %v635_v46, %v3501_v1 }
 0x1c3   : > { %2740 = vmatprep.subr.bf16.mxu0 %v3238_v12 }
 0x1c4   : > { %v3606_v4 = vpop.permute.xlu1 %517  ;;  %v3608_v50 = vpop.permute.xlu0 %499 }
 0x1c5   : > { %v633_v44 = vsel %vm627_vm9, %v624_v48, %v3608_v50  ;;  %v653_v48 = vsel %vm645_vm11, %v644_v25, %v3606_v4  ;;  %v840_v53 = vsel %vm543_vm1, %v3606_v4, 0 }
 0x1c8   : > { %v3628_v40 = vpop.permute.xlu1 %525  ;;  %v3630_v21 = vpop.permute.xlu0 %507 }
 0x1c9   : > { %4811 = vst [vmem:[#allocation35_spill] sm:$0xff] %v3628_v40  ;;  %v642_v23 = vsel %vm636_vm10, %v633_v44, %v3630_v21 }
 0x1cc   : > { %v3648_v0 = vpop.permute.xlu1 %515  ;;  %v3650_v22 = vpop.permute.xlu0 %523 }
 0x1cd   : > { %4812 = vst [vmem:[#allocation36_spill] sm:$0xff] %v3650_v22  ;;  %2954 = vmatprep.subr.msk.bf16.mxu1 %vm543_vm1, %v3648_v0  ;;  %v838_v24 = vsel %vm543_vm1, %v3648_v0, 0  ;;  %v651_v38 = vsel %vm645_vm11, %v642_v23, %v3648_v0 }
 0x1ce   : > { %2713 = vmatpush3.bf16.xpose.msra.mxu1 %v838_v24  ;;  %v662_v24 = vsel %vm654_vm12, %v653_v48, %v3628_v40  ;;  %v660_v44 = vsel %vm654_vm12, %v651_v38, %v3650_v22 }
 0x1cf   : > { %2955 = vmatprep.subr.msk.bf16.mxu1 %vm543_vm1, %v3606_v4 }
 0x1d0   : > { %v3670_v42 = vpop.permute.xlu1 %533  ;;  %v3672_v20 = vpop.permute.xlu0 %531 }
 0x1d1   : > { %v1869_v23 = vsel %vm543_vm1, %v3628_v40, %v3670_v42  ;;  %v1868_v46 = vsel %vm543_vm1, %v3650_v22, %v3672_v20  ;;  %v669_v48 = vsel %vm663_vm13, %v660_v44, %v3672_v20  ;;  %v671_v38 = vsel %vm663_vm13, %v662_v24, %v3670_v42 }
 0x1d4   : > { %v3690_v34 = vpop.permute.xlu1 %541  ;;  %v3692_v25 = vpop.permute.xlu0 %539 }
 0x1d5   : > { %v1087_v14 = vsel %vm543_vm1, %v3690_v34, %v3256_v17  ;;  %v1478_v51 = vsel %vm543_vm1, %v3670_v42, %v3690_v34  ;;  %v1873_v32 = vsel %vm556_vm2, %v1869_v23, %v3690_v34  ;;  %v1086_v49 = vsel %vm543_vm1, %v3692_v25, %v3259_v19 }
 0x1d6   : > { %v1091_v44 = vsel %vm556_vm2, %v1087_v14, %v3503_v2  ;;  %v1482_v24 = vsel %vm556_vm2, %v1478_v51, %v3256_v17  ;;  %v1877_v30 = vsel %vm565_vm3, %v1873_v32, %v3256_v17  ;;  %v1090_v47 = vsel %vm556_vm2, %v1086_v49, %v3519_v13  ;;  %2715 = vmatpush3.bf16.xpose.msra.mxu1 %v840_v53 }
 0x1d7   : > { %v1095_v23 = vsel %vm565_vm3, %v1091_v44, %v3517_v10  ;;  %v1486_v28 = vsel %vm565_vm3, %v1482_v24, %v3503_v2  ;;  %v1881_v45 = vsel %vm300_vm0, %v1877_v30, %v3503_v2  ;;  %v1094_v14 = vsel %vm565_vm3, %v1090_v47, %v3535_v60  ;;  %2780 = vmatprep.subr.bf16.mxu1 %v3441_v39 }
 0x1d8   : > { %v1099_v32 = vsel %vm300_vm0, %v1095_v23, %v3533_v59  ;;  %v1490_v49 = vsel %vm300_vm0, %v1486_v28, %v3517_v10  ;;  %v1885_v51 = vsel %vm582_vm4, %v1881_v45, %v3517_v10  ;;  %v1098_v53 = vsel %vm300_vm0, %v1094_v14, %v3565_v16  ;;  %v3745_v28 = vld [vmem:[%s4700_s4 + $0x10] sm:$0xff]   ;;  %v3750_v45 = vld [vmem:[%s4700_s4 + $0x18] sm:$0xff]  }
 0x1d9   : > { %v1103_v30 = vsel %vm582_vm4, %v1099_v32, %v3563_v15  ;;  %v1494_v47 = vsel %vm582_vm4, %v1490_v49, %v3533_v59  ;;  %v1889_v2 = vsel %vm591_vm5, %v1885_v51, %v3533_v59  ;;  %v1102_v44 = vsel %vm582_vm4, %v1098_v53, %v3575_v62 }
 0x1da   : > { %v1107_v10 = vsel %vm591_vm5, %v1103_v30, %v3573_v61  ;;  %v1498_v24 = vsel %vm591_vm5, %v1494_v47, %v3563_v15  ;;  %v1893_v59 = vsel %vm600_vm6, %v1889_v2, %v3563_v15  ;;  %v1106_v23 = vsel %vm591_vm5, %v1102_v44, %v3581_v3 }
 0x1db   : > { %v1111_v14 = vsel %vm600_vm6, %v1107_v10, %v3579_v63  ;;  %v1502_v32 = vsel %vm600_vm6, %v1498_v24, %v3573_v61  ;;  %v1110_v49 = vsel %vm600_vm6, %v1106_v23, %v3587_v7  ;;  %v1477_v51 = vsel %vm543_vm1, %v3672_v20, %v3692_v25 }
 0x1dc   : > { %v1481_v53 = vsel %vm556_vm2, %v1477_v51, %v3259_v19  ;;  %v1872_v15 = vsel %vm556_vm2, %v1868_v46, %v3692_v25  ;;  %v680_v30 = vsel %vm672_vm14, %v669_v48, %v3692_v25  ;;  %v683_v47 = vsel %vm672_vm14, %v671_v38, %v3690_v34 }
 0x1dd   : > { %v1485_v2 = vsel %vm565_vm3, %v1481_v53, %v3519_v13  ;;  %v1876_v44 = vsel %vm565_vm3, %v1872_v15, %v3259_v19  ;;  %v711_v10 = vmul.bf16 %v3745_v28, %v680_v30  ;;  %v712_v24 = vmul.bf16 %v3750_v45, %v683_v47 }
 0x1de   : > { %v1489_v23 = vsel %vm300_vm0, %v1485_v2, %v3535_v60  ;;  %v1880_v46 = vsel %vm300_vm0, %v1876_v44, %v3519_v13  ;;  %v1114_v48 = vsel %vm609_vm7, %v1110_v49, %v3591_v18  ;;  %v1115_v38 = vsel %vm609_vm7, %v1111_v14, %v3585_v5 }
 0x1df   : > { %v1493_v51 = vsel %vm582_vm4, %v1489_v23, %v3565_v16  ;;  %v1884_v53 = vsel %vm582_vm4, %v1880_v46, %v3535_v60  ;;  %2704 = vmatprep.mubr.bf16.mxu1 %v711_v10  ;;  %v1118_v15 = vsel %vm618_vm8, %v1114_v48, %v3595_v55  ;;  %v1119_v30 = vsel %vm618_vm8, %v1115_v38, %v3589_v8 }
 0x1e0   : > { %v1497_v13 = vsel %vm591_vm5, %v1493_v51, %v3575_v62  ;;  %v1888_v49 = vsel %vm591_vm5, %v1884_v53, %v3565_v16  ;;  %2705 = vmatmul.mubr.bf16.gmra.mrb[4].mxu1 %v712_v24  ;;  %v1122_v14 = vsel %vm627_vm9, %v1118_v15, %v3602_v6  ;;  %v1123_v60 = vsel %vm627_vm9, %v1119_v30, %v3593_v54 }
 0x1e1   : > { %v1501_v47 = vsel %vm600_vm6, %v1497_v13, %v3581_v3  ;;  %v1892_v2 = vsel %vm600_vm6, %v1888_v49, %v3575_v62  ;;  %2716 = vmatprep.mubr.msk.bf16.mxu1 %vm543_vm1, %v3233_v11  ;;  %v1126_v44 = vsel %vm636_vm10, %v1122_v14, %v3608_v50  ;;  %v1127_v16 = vsel %vm636_vm10, %v1123_v60, %v3600_v58 }
 0x1e2   : > { %v1130_v10 = vsel %vm645_vm11, %v1126_v44, %v3630_v21  ;;  %v1131_v24 = vsel %vm645_vm11, %v1127_v16, %v3501_v1  ;;  %v1505_v23 = vsel %vm609_vm7, %v1501_v47, %v3587_v7  ;;  %v1506_v62 = vsel %vm609_vm7, %v1502_v32, %v3579_v63 }
 0x1e3   : > { %v1134_v46 = vsel %vm654_vm12, %v1130_v10, %v3648_v0  ;;  %v1135_v48 = vsel %vm654_vm12, %v1131_v24, %v3606_v4  ;;  %v1509_v38 = vsel %vm618_vm8, %v1505_v23, %v3591_v18  ;;  %v1510_v51 = vsel %vm618_vm8, %v1506_v62, %v3585_v5 }
 0x1e4   : > { %v1138_v53 = vsel %vm663_vm13, %v1134_v46, %v3650_v22  ;;  %v1139_v15 = vsel %vm663_vm13, %v1135_v48, %v3628_v40  ;;  %v1513_v32 = vsel %vm627_vm9, %v1509_v38, %v3595_v55  ;;  %v1514_v30 = vsel %vm627_vm9, %v1510_v51, %v3589_v8 }
 0x1e5   : > { %v3843_v13 = vsel %vm672_vm14, %v1138_v53, %v3672_v20  ;;  %v3847_v49 = vsel %vm672_vm14, %v1139_v15, %v3670_v42  ;;  %v1517_v14 = vsel %vm636_vm10, %v1513_v32, %v3602_v6  ;;  %v1518_v60 = vsel %vm636_vm10, %v1514_v30, %v3593_v54 }
 0x1e6   : > { %v1521_v16 = vsel %vm645_vm11, %v1517_v14, %v3608_v50  ;;  %v1522_v10 = vsel %vm645_vm11, %v1518_v60, %v3600_v58  ;;  %v1896_v62 = vsel %vm609_vm7, %v1892_v2, %v3581_v3  ;;  %v1897_v46 = vsel %vm609_vm7, %v1893_v59, %v3573_v61 }
 0x1e7   : > { %v1525_v24 = vsel %vm654_vm12, %v1521_v16, %v3630_v21  ;;  %v1526_v23 = vsel %vm654_vm12, %v1522_v10, %v3501_v1  ;;  %v1900_v51 = vsel %vm618_vm8, %v1896_v62, %v3587_v7  ;;  %v1901_v53 = vsel %vm618_vm8, %v1897_v46, %v3579_v63 }
 0x1e8   : > { %2717 = vmatmul.mubr.msk.bf16.vlgmr.msra.gmra.mrb[0].mxu1 %vm543_vm1, %v3231_v9  ;;  %v1529_v48 = vsel %vm663_vm13, %v1525_v24, %v3648_v0  ;;  %v1530_v38 = vsel %vm663_vm13, %v1526_v23, %v3606_v4  ;;  %v1904_v15 = vsel %vm627_vm9, %v1900_v51, %v3591_v18  ;;  %v1905_v14 = vsel %vm627_vm9, %v1901_v53, %v3585_v5 }
 0x1e9   : > { %2781 = vmatpush3.bf16.msra.mxu1 %v3441_v39  ;;  %2720 = vmatprep.mubr.msk.bf16.mxu1 %vm543_vm1, %v3259_v19  ;;  %v3884_v59 = vsel %vm672_vm14, %v1529_v48, %v3650_v22  ;;  %v3888_v2 = vsel %vm672_vm14, %v1530_v38, %v3628_v40  ;;  %v1908_v19 = vsel %vm636_vm10, %v1904_v15, %v3595_v55 }
 0x1ea   : > { %2782 = vmatprep.subr.bf16.mxu1 %v3435_v36  ;;  %v1912_v60 = vsel %vm645_vm11, %v1908_v19, %v3602_v6  ;;  %v1909_v16 = vsel %vm636_vm10, %v1905_v14, %v3589_v8 }
 0x1eb   : > { %v1916_v10 = vsel %vm654_vm12, %v1912_v60, %v3608_v50  ;;  %v1913_v24 = vsel %vm645_vm11, %v1909_v16, %v3593_v54 }
 0x1ec   : > { %v1920_v55 = vsel %vm663_vm13, %v1916_v10, %v3630_v21  ;;  %v1917_v23 = vsel %vm654_vm12, %v1913_v24, %v3600_v58 }
 0x1ed   : > { %2783 = vmatpush3.bf16.msra.mxu1 %v3435_v36  ;;  %v3917_v62 = vsel %vm672_vm14, %v1920_v55, %v3648_v0  ;;  %v1921_v8 = vsel %vm663_vm13, %v1917_v23, %v3501_v1 }
 0x1ee   : > { %2784 = vmatprep.subr.bf16.mxu1 %v3591_v18  ;;  %4813 = vst [vmem:[#allocation37_spill] sm:$0xff] %v3917_v62  ;;  %v3925_v48 = vsel %vm672_vm14, %v1921_v8, %v3606_v4  ;;  %v1084_v8 = vsel %vm543_vm1, %v3485_v57, %v3233_v11 }
 0x1ef   : > { %4814 = vst [vmem:[#allocation38_spill] sm:$0xff] %v3925_v48 }
 0x1f0   : > { %2721 = vmatmul.mubr.msk.bf16.gmra.mrb[4].mxu1 %vm543_vm1, %v3256_v17 }
 0x1f1   : > { %2785 = vmatpush3.bf16.msra.mxu1 %v3591_v18 }
 0x1f2   : > { %2786 = vmatprep.subr.bf16.mxu1 %v3585_v5 }
 0x1f5   : > { %2787 = vmatpush3.bf16.msra.mxu1 %v3585_v5 }
 0x1f6   : > { %2796 = vmatprep.subr.bf16.mxu1 %v3238_v12 }
 0x2bb   : > { %v2718_v0 = vpop.f32.mrb[0].mxu1 }
 0x2bc   : > { %v876_v51 = vpop.f32.mrb[1].mxu1  ;;  %v913_v19 = vsel %vm609_vm7, %v2718_v0, -inf }
 0x2bd   : > { %v2719_v53 = vpop.f32.mrb[2].mxu1  ;;  %v907_v4 = vsel %vm609_vm7, %v876_v51, -inf }
 0x2be   : > { %908 = vmax.xlane.f32.xlu0 %v907_v4  ;;  %v879_v15 = vpop.f32.mrb[3].mxu1  ;;  %v916_v5 = vsel %vm609_vm7, %v2719_v53, -inf  ;;  %v1088_v4 = vsel %vm556_vm2, %v1084_v8, %v3421_v29 }
 0x2bf   : > { %v910_v17 = vsel %vm609_vm7, %v879_v15, -inf }
 0x2c0   : > { %911 = vmax.xlane.f32.xlu1 %v910_v17  ;;  %v1092_v17 = vsel %vm565_vm3, %v1088_v4, %v3483_v56 }
 0x2c2   : > { %914 = vmax.xlane.f32.xlu0 %v913_v19  ;;  %v1096_v19 = vsel %vm300_vm0, %v1092_v17, %v3425_v31 }
 0x2c3   : > { %v2722_v18 = vpop.f32.mrb[4].mxu1 }
 0x2c4   : > { %v892_v14 = vpop.f32.mrb[5].mxu1  ;;  %v925_v24 = vsel %vm609_vm7, %v2722_v18, -inf }
 0x2c5   : > { %v2723_v60 = vpop.f32.mrb[6].mxu1  ;;  %v919_v16 = vsel %vm609_vm7, %v892_v14, -inf }
 0x2c6   : > { %917 = vmax.xlane.f32.xlu0 %v916_v5  ;;  %920 = vmax.xlane.f32.xlu1 %v919_v16  ;;  %v895_v10 = vpop.f32.mrb[7].mxu1  ;;  %v928_v23 = vsel %vm609_vm7, %v2723_v60, -inf  ;;  %v1100_v5 = vsel %vm582_vm4, %v1096_v19, %v3429_v33 }
 0x2c7   : > { %v922_v55 = vsel %vm609_vm7, %v895_v10, -inf }
 0x2ca   : > { %926 = vmax.xlane.f32.xlu1 %v925_v24  ;;  %923 = vmax.xlane.f32.xlu0 %v922_v55 }
 0x2ce   : > { %929 = vmax.xlane.f32.xlu0 %v928_v23  ;;  %v1104_v23 = vsel %vm591_vm5, %v1100_v5, %v3433_v35 }
 0x2cf   : > { %v1108_v4 = vsel %vm600_vm6, %v1104_v23, %v3437_v37 }
 0x34b   : > { %v909_v16 = vpop.xlane.xlu0 %908 }
 0x34c   : > { %v931_v24 = vsub.f32 %v876_v51, %v909_v16  ;;  %v1112_v51 = vsel %vm609_vm7, %v1108_v4, %v3441_v39 }
 0x34d   : > { %v912_v55 = vpop.xlane.xlu1 %911 }
 0x34e   : > { %v939_v38 = vmul.f32 1.442695, %v931_v24  ;;  %v932_v46 = vsub.f32 %v879_v15, %v912_v55  ;;  %v1085_v15 = vsel %vm543_vm1, %v3473_v52, %v3231_v9 }
 0x34f   : > { %v915_v30 = vpop.xlane.xlu0 %914 }
 0x350   : > { %v941_v32 = vmul.f32 1.442695, %v932_v46  ;;  %v933_v8 = vsub.f32 %v2718_v0, %v915_v30  ;;  %3011 = vpow2.f32 %v939_v38  ;;  %v1116_v38 = vsel %vm618_vm8, %v1112_v51, %v3445_v41 }
 0x352   : > { %3013 = vpow2.f32 %v941_v32  ;;  %v943_v17 = vmul.f32 1.442695, %v933_v8 }
 0x353   : > { %v918_v44 = vpop.xlane.xlu0 %917  ;;  %v921_v47 = vpop.xlane.xlu1 %920 }
 0x354   : > { %v934_v19 = vsub.f32 %v2719_v53, %v918_v44  ;;  %v935_v40 = vsub.f32 %v892_v14, %v921_v47  ;;  %3015 = vpow2.f32 %v943_v17  ;;  %v1089_v47 = vsel %vm556_vm2, %v1085_v15, %v3413_v27  ;;  %v4819_v15 = vld [vmem:[#allocation23_spill] sm:$0xff] }
 0x355   : > { %v1120_v53 = vsel %vm627_vm9, %v1116_v38, %v3452_v43  ;;  %v1093_v8 = vsel %vm565_vm3, %v1089_v47, %v3411_v26  ;;  %v4824_v47 = vld [vmem:[#allocation15_spill] sm:$0xff] }
 0x356   : > { %v945_v5 = vmul.f32 1.442695, %v934_v19  ;;  %v947_v32 = vmul.f32 1.442695, %v935_v40  ;;  %v4818_v19 = vld [vmem:[#allocation11_spill] sm:$0xff] }
 0x357   : > { %v927_v30 = vpop.xlane.xlu1 %926  ;;  %v924_v46 = vpop.xlane.xlu0 %923  ;;  %v1097_v51 = vsel %vm300_vm0, %v1093_v8, %v4818_v19 }
 0x358   : > { %3017 = vpow2.f32 %v945_v5  ;;  %v937_v0 = vsub.f32 %v2722_v18, %v927_v30  ;;  %v936_v16 = vsub.f32 %v895_v10, %v924_v46  ;;  %v4817_v10 = vld [vmem:[#allocation21_spill] sm:$0xff] }
 0x359   : > { %3019 = vpow2.f32 %v947_v32  ;;  %v1124_v4 = vsel %vm636_vm10, %v1120_v53, %v4817_v10  ;;  %v4822_v46 = vld [vmem:[#allocation13_spill] sm:$0xff] }
 0x35a   : > { %v949_v44 = vmul.f32 1.442695, %v936_v16  ;;  %v3969_v14 = vpop.eup %3011  ;;  %v951_v24 = vmul.f32 1.442695, %v937_v0  ;;  %v1128_v5 = vsel %vm645_vm11, %v1124_v4, %v4819_v15  ;;  %v1101_v38 = vsel %vm582_vm4, %v1097_v51, %v4822_v46  ;;  %v4823_v0 = vld [vmem:[#allocation25_spill] sm:$0xff] }
 0x35b   : > { %4815 = vst [vmem:[#allocation39_spill] sm:$0xff] %v3969_v14  ;;  %v930_v55 = vpop.xlane.xlu0 %929  ;;  %v1132_v16 = vsel %vm654_vm12, %v1128_v5, %v4823_v0  ;;  %v4831_v5 = vld [vmem:[#allocation28_spill] sm:$0xff] }
 0x35c   : > { %v3971_v23 = vpop.eup %3013  ;;  %v938_v40 = vsub.f32 %v2723_v60, %v930_v55  ;;  %3021 = vpow2.f32 %v949_v44  ;;  %v1105_v44 = vsel %vm591_vm5, %v1101_v38, %v4824_v47 }
 0x35d   : > { %4816 = vst [vmem:[#allocation40_spill] sm:$0xff] %v3971_v23  ;;  %v979_v18 = vpack.c.bf16 %v3971_v23, %v3969_v14  ;;  %3023 = vpow2.f32 %v951_v24  ;;  %v4826_v24 = vld [vmem:[#allocation27_spill] sm:$0xff] }
 0x35e   : > { %v953_v17 = vmul.f32 1.442695, %v938_v40  ;;  %v3984_v30 = vpop.eup %3015  ;;  %v1136_v55 = vsel %vm663_vm13, %v1132_v16, %v4826_v24  ;;  %v4828_v40 = vld [vmem:[#allocation4_spill] sm:$0xff]  ;;  %v4833_v16 = vld [vmem:[#allocation5_spill] sm:$0xff] }
 0x35f   : > { %2732 = vmatprep.mubr.msk.bf16.mxu0 %vm609_vm7, %v979_v18  ;;  %4820 = vst [vmem:[#allocation21_spill] sm:$0xff] %v3984_v30  ;;  %v4829_v18 = vld [vmem:[#allocation16_spill] sm:$0xff]  ;;  %v1140_v38 = vsel %vm672_vm14, %v1136_v55, %v4831_v5  ;;  %v4835_v55 = vld [vmem:[#allocation17_spill] sm:$0xff] }
 0x360   : > { %3025 = vpow2.f32 %v953_v17  ;;  %v1109_v4 = vsel %vm600_vm6, %v1105_v44, %v4829_v18 }
 0x362   : > { %v3986_v60 = vpop.eup %3017 }
 0x363   : > { %4821 = vst [vmem:[#allocation11_spill] sm:$0xff] %v3986_v60  ;;  %v980_v32 = vpack.c.bf16 %v3986_v60, %v3984_v30  ;;  %v3997_v53 = vpop.eup %3019  ;;  %v4836_v60 = vld [vmem:[#allocation6_spill] sm:$0xff]  ;;  %v4838_v30 = vld [vmem:[#allocation7_spill] sm:$0xff] }
 0x364   : > { %4825 = vst [vmem:[#allocation23_spill] sm:$0xff] %v3997_v53 }
 0x365   : > { %2733 = vmatmul.mubr.msk.bf16.vlgmr.msra.gmra.mrb[8].mxu0 %vm609_vm7, %v980_v32 }
 0x366   : > { %2741 = vmatpush3.bf16.msra.mxu0 %v3238_v12  ;;  %v4002_v8 = vpop.eup %3021  ;;  %v1113_v12 = vsel %vm609_vm7, %v1109_v4, %v3435_v36 }
 0x367   : > { %4827 = vst [vmem:[#allocation13_spill] sm:$0xff] %v4002_v8  ;;  %2742 = vmatprep.subr.bf16.mxu0 %v4828_v40  ;;  %v981_v17 = vpack.c.bf16 %v4002_v8, %v3997_v53  ;;  %v4009_v51 = vpop.eup %3023  ;;  %v4834_v8 = vld [vmem:[#allocation31_spill] sm:$0xff] }
 0x368   : > { %4830 = vst [vmem:[#allocation25_spill] sm:$0xff] %v4009_v51  ;;  %v1148_v53 = vmul.bf16 %v4834_v8, %v1140_v38 }
 0x369   : > { %2736 = vmatprep.mubr.msk.bf16.mxu0 %vm609_vm7, %v981_v17  ;;  %v1117_v17 = vsel %vm618_vm8, %v1113_v12, %v4835_v55  ;;  %v4842_v12 = vld [vmem:[#allocation22_spill] sm:$0xff] }
 0x36a   : > { %v4013_v32 = vpop.eup %3025  ;;  %2743 = vmatpush3.bf16.msra.mxu0 %v4828_v40  ;;  %v4837_v40 = vld [vmem:[#allocation18_spill] sm:$0xff] }
 0x36b   : > { %4832 = vst [vmem:[#allocation15_spill] sm:$0xff] %v4013_v32  ;;  %2744 = vmatprep.subr.bf16.mxu0 %v4833_v16  ;;  %v982_v44 = vpack.c.bf16 %v4013_v32, %v4009_v51  ;;  %v1121_v4 = vsel %vm627_vm9, %v1117_v17, %v4837_v40  ;;  %v4839_v32 = vld [vmem:[#allocation19_spill] sm:$0xff]  ;;  %v4843_v17 = vld [vmem:[#allocation9_spill] sm:$0xff] }
 0x36c   : > { %v1125_v38 = vsel %vm636_vm10, %v1121_v4, %v4839_v32  ;;  %v4845_v4 = vld [vmem:[#allocation10_spill] sm:$0xff] }
 0x36d   : > { %2737 = vmatmul.mubr.msk.bf16.gmra.mrb[12].mxu0 %vm609_vm7, %v982_v44  ;;  %v4840_v44 = vld [vmem:[#allocation8_spill] sm:$0xff] }
 0x36e   : > { %2745 = vmatpush3.bf16.msra.mxu0 %v4833_v16  ;;  %2756 = vmatprep.mubr.bf16.mxu0 %v1148_v53  ;;  %v4841_v53 = vld [vmem:[#allocation20_spill] sm:$0xff] }
 0x36f   : > { %2746 = vmatprep.subr.bf16.mxu0 %v4836_v60  ;;  %v1129_v16 = vsel %vm645_vm11, %v1125_v38, %v4841_v53  ;;  %v4847_v38 = vld [vmem:[#allocation32_spill] sm:$0xff] }
 0x370   : > { %v1133_v51 = vsel %vm654_vm12, %v1129_v16, %v4842_v12  ;;  %v4848_v16 = vmul.bf16 %v3745_v28, %v3843_v13  ;;  %v1229_v13 = vsel %vm543_vm1, %v3630_v21, 0 }
 0x372   : > { %2747 = vmatpush3.bf16.msra.mxu0 %v4836_v60  ;;  %v4844_v60 = vld [vmem:[#allocation24_spill] sm:$0xff] }
 0x373   : > { %2748 = vmatprep.subr.bf16.mxu0 %v4838_v30  ;;  %v1137_v23 = vsel %vm663_vm13, %v1133_v51, %v4844_v60  ;;  %v1225_v51 = vsel %vm543_vm1, %v4819_v15, 0 }
 0x376   : > { %2749 = vmatpush3.bf16.msra.mxu0 %v4838_v30  ;;  %v4846_v30 = vld [vmem:[#allocation26_spill] sm:$0xff] }
 0x377   : > { %2750 = vmatprep.subr.bf16.mxu0 %v4840_v44  ;;  %v1142_v14 = vsel %vm672_vm14, %v1137_v23, %v4846_v30  ;;  %v4849_v23 = vmul.bf16 %v3750_v45, %v3847_v49  ;;  %v1231_v49 = vsel %vm543_vm1, %v3501_v1, 0 }
 0x37a   : > { %2751 = vmatpush3.bf16.msra.mxu0 %v4840_v44  ;;  %v1149_v44 = vmul.bf16 %v4847_v38, %v1142_v14  ;;  %v1227_v14 = vsel %vm543_vm1, %v4841_v53, 0 }
 0x37b   : > { %2752 = vmatprep.subr.bf16.mxu0 %v4843_v17 }
 0x37e   : > { %2753 = vmatpush3.bf16.msra.mxu0 %v4843_v17 }
 0x37f   : > { %2754 = vmatprep.subr.bf16.mxu0 %v4845_v4 }
 0x382   : > { %2755 = vmatpush3.bf16.msra.mxu0 %v4845_v4 }
 0x383   : > { %2956 = vmatprep.subr.msk.bf16.mxu0 %vm543_vm1, %v4819_v15 }
 0x385   : > { %2757 = vmatmul.mubr.bf16.vlgmr.msra.gmra.mrb[16].mxu0 %v1149_v44 }
 0x386   : > { %2760 = vmatprep.mubr.bf16.mxu0 %v4848_v16 }
 0x38b   : > { %2765 = vmatpush3.bf16.xpose.msra.mxu0 %v1225_v51 }
 0x38c   : > { %2957 = vmatprep.subr.msk.bf16.mxu0 %vm543_vm1, %v4841_v53 }
 0x38d   : > { %2761 = vmatmul.mubr.bf16.gmra.mrb[20].mxu0 %v4849_v23 }
 0x38e   : > { %2772 = vmatprep.mubr.msk.bf16.mxu0 %vm543_vm1, %v3485_v57 }
 0x393   : > { %2767 = vmatpush3.bf16.xpose.msra.mxu0 %v1227_v14 }
 0x394   : > { %2958 = vmatprep.subr.msk.bf16.mxu0 %vm543_vm1, %v3630_v21  ;;  %v4091_v21 = vld [vmem:[%s4701_s5] sm:$0xff]  }
 0x39b   : > { %2769 = vmatpush3.bf16.xpose.msra.mxu0 %v1229_v13 }
 0x39c   : > { %2959 = vmatprep.subr.msk.bf16.mxu0 %vm543_vm1, %v3501_v1 }
 0x3a3   : > { %2771 = vmatpush3.bf16.xpose.msra.mxu0 %v1231_v49 }
 0x3a4   : > { %2836 = vmatprep.subr.bf16.mxu0 %v3437_v37 }
 0x3aa   : > { %2773 = vmatmul.mubr.msk.bf16.vlgmr.msra.gmra.mrb[16].mxu0 %vm543_vm1, %v3473_v52 }
 0x3ab   : > { %2776 = vmatprep.mubr.msk.bf16.mxu0 %vm543_vm1, %v3692_v25  ;;  %2837 = vmatpush3.bf16.msra.mxu0 %v3437_v37 }
 0x3ac   : > { %2838 = vmatprep.subr.bf16.mxu0 %v4829_v18 }
 0x3af   : > { %2839 = vmatpush3.bf16.msra.mxu0 %v4829_v18 }
 0x3b0   : > { %2840 = vmatprep.subr.bf16.mxu0 %v3587_v7 }
 0x3b2   : > { %2777 = vmatmul.mubr.msk.bf16.gmra.mrb[20].mxu0 %vm543_vm1, %v3690_v34 }
 0x3b3   : > { %2841 = vmatpush3.bf16.msra.mxu0 %v3587_v7 }
 0x3b4   : > { %2842 = vmatprep.subr.bf16.mxu0 %v3579_v63 }
 0x3b7   : > { %2843 = vmatpush3.bf16.msra.mxu0 %v3579_v63 }
 0x3b8   : > { %2852 = vmatprep.subr.bf16.mxu0 %v4091_v21 }
 0x438   : > { %v4094_v1 = vpop.f32.mrb[8].mxu0 }
 0x439   : > { %4850 = vst [vmem:[#allocation27_spill] sm:$0xff] %v4094_v1  ;;  %v4096_v25 = vpop.f32.mrb[9].mxu0 }
 0x43a   : > { %4851 = vst [vmem:[#allocation4_spill] sm:$0xff] %v4096_v25  ;;  %v4098_v17 = vpop.f32.mrb[10].mxu0 }
 0x43b   : > { %4852 = vst [vmem:[#allocation16_spill] sm:$0xff] %v4098_v17  ;;  %v4100_v34 = vpop.f32.mrb[11].mxu0 }
 0x43c   : > { %4853 = vst [vmem:[#allocation28_spill] sm:$0xff] %v4100_v34 }
 0x440   : > { %v4102_v7 = vpop.f32.mrb[12].mxu0 }
 0x441   : > { %4854 = vst [vmem:[#allocation5_spill] sm:$0xff] %v4102_v7  ;;  %v4104_v4 = vpop.f32.mrb[13].mxu0 }
 0x442   : > { %4855 = vst [vmem:[#allocation31_spill] sm:$0xff] %v4104_v4  ;;  %v4106_v63 = vpop.f32.mrb[14].mxu0 }
 0x443   : > { %4856 = vst [vmem:[#allocation17_spill] sm:$0xff] %v4106_v63  ;;  %v4108_v44 = vpop.f32.mrb[15].mxu0 }
 0x444   : > { %4857 = vst [vmem:[#allocation6_spill] sm:$0xff] %v4108_v44 }
 0x47d   : > { %v2774_v16 = vpop.f32.mrb[16].mxu0 }
 0x47e   : > { %v1267_v51 = vpop.f32.mrb[17].mxu0  ;;  %v1304_v17 = vsel %vm609_vm7, %v2774_v16, -inf }
 0x47f   : > { %v2775_v23 = vpop.f32.mrb[18].mxu0  ;;  %v1298_v14 = vsel %vm609_vm7, %v1267_v51, -inf }
 0x480   : > { %1299 = vmax.xlane.f32.xlu1 %v1298_v14  ;;  %v1270_v13 = vpop.f32.mrb[19].mxu0  ;;  %v1307_v4 = vsel %vm609_vm7, %v2775_v23, -inf }
 0x481   : > { %v1301_v49 = vsel %vm609_vm7, %v1270_v13, -inf }
 0x482   : > { %1302 = vmax.xlane.f32.xlu0 %v1301_v49 }
 0x484   : > { %1305 = vmax.xlane.f32.xlu1 %v1304_v17  ;;  %v1475_v17 = vsel %vm543_vm1, %v4831_v5, %v3485_v57 }
 0x485   : > { %v2778_v7 = vpop.f32.mrb[20].mxu0 }
 0x486   : > { %1308 = vmax.xlane.f32.xlu0 %v1307_v4  ;;  %v1283_v63 = vpop.f32.mrb[21].mxu0  ;;  %v1316_v14 = vsel %vm609_vm7, %v2778_v7, -inf  ;;  %v1479_v4 = vsel %vm556_vm2, %v1475_v17, %v3233_v11 }
 0x487   : > { %v2779_v1 = vpop.f32.mrb[22].mxu0  ;;  %v1310_v44 = vsel %vm609_vm7, %v1283_v63, -inf }
 0x488   : > { %1311 = vmax.xlane.f32.xlu1 %v1310_v44  ;;  %v1286_v34 = vpop.f32.mrb[23].mxu0  ;;  %v1319_v49 = vsel %vm609_vm7, %v2779_v1, -inf  ;;  %v1483_v44 = vsel %vm565_vm3, %v1479_v4, %v3421_v29 }
 0x489   : > { %v1313_v25 = vsel %vm609_vm7, %v1286_v34, -inf  ;;  %v1487_v22 = vsel %vm300_vm0, %v1483_v44, %v3483_v56 }
 0x48a   : > { %1314 = vmax.xlane.f32.xlu0 %v1313_v25  ;;  %v1491_v25 = vsel %vm582_vm4, %v1487_v22, %v3425_v31 }
 0x48c   : > { %1317 = vmax.xlane.f32.xlu1 %v1316_v14 }
 0x48e   : > { %1320 = vmax.xlane.f32.xlu0 %v1319_v49  ;;  %v1495_v49 = vsel %vm591_vm5, %v1491_v25, %v3429_v33 }
 0x48f   : > { %v1499_v17 = vsel %vm600_vm6, %v1495_v49, %v3433_v35 }
 0x490   : > { %v1503_v22 = vsel %vm609_vm7, %v1499_v17, %v3437_v37 }
 0x50d   : > { %v1300_v14 = vpop.xlane.xlu1 %1299 }
 0x50e   : > { %v1322_v54 = vsub.f32 %v1267_v51, %v1300_v14 }
 0x50f   : > { %v1303_v6 = vpop.xlane.xlu0 %1302 }
 0x510   : > { %v1330_v48 = vmul.f32 1.442695, %v1322_v54  ;;  %v1323_v62 = vsub.f32 %v1270_v13, %v1303_v6  ;;  %v1476_v54 = vsel %vm543_vm1, %v4846_v30, %v3473_v52 }
 0x511   : > { %v1306_v57 = vpop.xlane.xlu1 %1305 }
 0x512   : > { %v1332_v11 = vmul.f32 1.442695, %v1323_v62  ;;  %v1324_v4 = vsub.f32 %v2774_v16, %v1306_v57  ;;  %3027 = vpow2.f32 %v1330_v48  ;;  %v1507_v57 = vsel %vm618_vm8, %v1503_v22, %v3441_v39 }
 0x513   : > { %v1309_v29 = vpop.xlane.xlu0 %1308  ;;  %v1511_v25 = vsel %vm627_vm9, %v1507_v57, %v3445_v41 }
 0x514   : > { %3029 = vpow2.f32 %v1332_v11  ;;  %v1334_v44 = vmul.f32 1.442695, %v1324_v4  ;;  %v1325_v56 = vsub.f32 %v2775_v23, %v1309_v29  ;;  %v1480_v29 = vsel %vm556_vm2, %v1476_v54, %v3231_v9 }
 0x515   : > { %v1312_v31 = vpop.xlane.xlu1 %1311 }
 0x516   : > { %v1336_v6 = vmul.f32 1.442695, %v1325_v56  ;;  %v1326_v51 = vsub.f32 %v1283_v63, %v1312_v31  ;;  %3031 = vpow2.f32 %v1334_v44  ;;  %v1484_v31 = vsel %vm565_vm3, %v1480_v29, %v3413_v27 }
 0x517   : > { %v1315_v13 = vpop.xlane.xlu0 %1314 }
 0x518   : > { %3033 = vpow2.f32 %v1336_v6  ;;  %v1338_v62 = vmul.f32 1.442695, %v1326_v51  ;;  %v1327_v11 = vsub.f32 %v1286_v34, %v1315_v13  ;;  %v1515_v34 = vsel %vm636_vm10, %v1511_v25, %v3452_v43 }
 0x519   : > { %v1318_v48 = vpop.xlane.xlu1 %1317  ;;  %v1519_v22 = vsel %vm645_vm11, %v1515_v34, %v4817_v10 }
 0x51a   : > { %v1340_v16 = vmul.f32 1.442695, %v1327_v11  ;;  %v1328_v23 = vsub.f32 %v2778_v7, %v1318_v48  ;;  %3035 = vpow2.f32 %v1338_v62  ;;  %v1488_v7 = vsel %vm300_vm0, %v1484_v31, %v3411_v26  ;;  %v4182_v48 = vld [vmem:[%s4701_s5 + $0x8] sm:$0xff]  }
 0x51b   : > { %v1321_v56 = vpop.xlane.xlu0 %1320  ;;  %v1492_v6 = vsel %vm582_vm4, %v1488_v7, %v4818_v19  ;;  %v1523_v13 = vsel %vm654_vm12, %v1519_v22, %v4819_v15 }
 0x51c   : > { %3037 = vpow2.f32 %v1340_v16  ;;  %v1342_v63 = vmul.f32 1.442695, %v1328_v23  ;;  %v1329_v14 = vsub.f32 %v2779_v1, %v1321_v56  ;;  %v4146_v49 = vpop.eup %3027  ;;  %v1496_v62 = vsel %vm591_vm5, %v1492_v6, %v4822_v46 }
 0x51d   : > { %v1527_v29 = vsel %vm663_vm13, %v1523_v13, %v4823_v0  ;;  %v1500_v23 = vsel %vm600_vm6, %v1496_v62, %v4824_v47 }
 0x51e   : > { %v4150_v17 = vpop.eup %3029  ;;  %v1344_v4 = vmul.f32 1.442695, %v1329_v14  ;;  %3039 = vpow2.f32 %v1342_v63  ;;  %v1531_v56 = vsel %vm672_vm14, %v1527_v29, %v4826_v24  ;;  %v1504_v63 = vsel %vm609_vm7, %v1500_v23, %v4829_v18  ;;  %v4202_v14 = vld [vmem:[%s4701_s5 + $0x10] sm:$0xff]   ;;  %v4253_v23 = vld [vmem:[%s4701_s5 + $0x38] sm:$0xff]  }
 0x51f   : > { %v1370_v44 = vpack.c.bf16 %v4150_v17, %v4146_v49  ;;  %v1508_v7 = vsel %vm618_vm8, %v1504_v63, %v3435_v36  ;;  %v4244_v29 = vld [vmem:[%s4701_s5 + $0x30] sm:$0xff]  }
 0x520   : > { %3041 = vpow2.f32 %v1344_v4  ;;  %v4158_v1 = vpop.eup %3031  ;;  %v1539_v4 = vmul.bf16 %v4834_v8, %v1531_v56  ;;  %v1512_v22 = vsel %vm627_vm9, %v1508_v7, %v4835_v55  ;;  %v4224_v8 = vld [vmem:[%s4701_s5 + $0x20] sm:$0xff]   ;;  %v4864_v7 = vmul.bf16 %v3750_v45, %v3888_v2 }
 0x521   : > { %2788 = vmatprep.mubr.msk.bf16.mxu1 %vm609_vm7, %v1370_v44  ;;  %v4215_v44 = vld [vmem:[%s4701_s5 + $0x18] sm:$0xff]   ;;  %v1516_v6 = vsel %vm636_vm10, %v1512_v22, %v4837_v40  ;;  %v1622_v2 = vsel %vm543_vm1, %v3600_v58, 0 }
 0x522   : > { %v4161_v54 = vpop.eup %3033  ;;  %v1520_v13 = vsel %vm645_vm11, %v1516_v6, %v4839_v32 }
 0x523   : > { %4858 = vst [vmem:[#allocation18_spill] sm:$0xff] %v4161_v54  ;;  %v1371_v51 = vpack.c.bf16 %v4161_v54, %v4158_v1  ;;  %v1524_v62 = vsel %vm654_vm12, %v1520_v13, %v4841_v53 }
 0x524   : > { %v4169_v57 = vpop.eup %3035 }
 0x525   : > { %4859 = vst [vmem:[#allocation7_spill] sm:$0xff] %v4169_v57  ;;  %2789 = vmatmul.mubr.msk.bf16.vlgmr.msra.gmra.mrb[8].mxu1 %vm609_vm7, %v1371_v51  ;;  %v4233_v51 = vld [vmem:[%s4701_s5 + $0x28] sm:$0xff]  }
 0x526   : > { %v4174_v11 = vpop.eup %3037  ;;  %2797 = vmatpush3.bf16.msra.mxu1 %v4091_v21 }
 0x527   : > { %4860 = vst [vmem:[#allocation19_spill] sm:$0xff] %v4174_v11  ;;  %2798 = vmatprep.subr.bf16.mxu1 %v4182_v48  ;;  %v1372_v16 = vpack.c.bf16 %v4174_v11, %v4169_v57 }
 0x528   : > { %v4189_v25 = vpop.eup %3039 }
 0x529   : > { %4861 = vst [vmem:[#allocation8_spill] sm:$0xff] %v4189_v25  ;;  %2792 = vmatprep.mubr.msk.bf16.mxu1 %vm609_vm7, %v1372_v16  ;;  %v1528_v16 = vsel %vm663_vm13, %v1524_v62, %v4842_v12 }
 0x52a   : > { %v4194_v31 = vpop.eup %3041  ;;  %2799 = vmatpush3.bf16.msra.mxu1 %v4182_v48  ;;  %v1533_v56 = vsel %vm672_vm14, %v1528_v16, %v4844_v60 }
 0x52b   : > { %4862 = vst [vmem:[#allocation20_spill] sm:$0xff] %v4194_v31  ;;  %2800 = vmatprep.subr.bf16.mxu1 %v4202_v14  ;;  %v1373_v34 = vpack.c.bf16 %v4194_v31, %v4189_v25  ;;  %v1540_v63 = vmul.bf16 %v4847_v38, %v1533_v56  ;;  %v1618_v38 = vsel %vm543_vm1, %v4839_v32, 0  ;;  %v4877_v31 = vld [vmem:[#allocation14_spill] sm:$0xff] }
 0x52d   : > { %2793 = vmatmul.mubr.msk.bf16.gmra.mrb[12].mxu1 %vm609_vm7, %v1373_v34  ;;  %v4863_v34 = vmul.bf16 %v3745_v28, %v3884_v59  ;;  %v1620_v59 = vsel %vm543_vm1, %v3608_v50, 0 }
 0x52e   : > { %2801 = vmatpush3.bf16.msra.mxu1 %v4202_v14  ;;  %2812 = vmatprep.mubr.bf16.mxu1 %v1539_v4  ;;  %v1616_v4 = vsel %vm543_vm1, %v4817_v10, 0 }
 0x52f   : > { %2802 = vmatprep.subr.bf16.mxu1 %v4215_v44 }
 0x532   : > { %2803 = vmatpush3.bf16.msra.mxu1 %v4215_v44 }
 0x533   : > { %2804 = vmatprep.subr.bf16.mxu1 %v4224_v8 }
 0x536   : > { %2805 = vmatpush3.bf16.msra.mxu1 %v4224_v8 }
 0x537   : > { %2806 = vmatprep.subr.bf16.mxu1 %v4233_v51 }
 0x53a   : > { %2807 = vmatpush3.bf16.msra.mxu1 %v4233_v51 }
 0x53b   : > { %2808 = vmatprep.subr.bf16.mxu1 %v4244_v29 }
 0x53e   : > { %2809 = vmatpush3.bf16.msra.mxu1 %v4244_v29 }
 0x53f   : > { %2810 = vmatprep.subr.bf16.mxu1 %v4253_v23 }
 0x542   : > { %2811 = vmatpush3.bf16.msra.mxu1 %v4253_v23 }
 0x543   : > { %2960 = vmatprep.subr.msk.bf16.mxu1 %vm543_vm1, %v4817_v10 }
 0x545   : > { %2813 = vmatmul.mubr.bf16.vlgmr.msra.gmra.mrb[16].mxu1 %v1540_v63 }
 0x546   : > { %2816 = vmatprep.mubr.bf16.mxu1 %v4863_v34 }
 0x54b   : > { %2821 = vmatpush3.bf16.xpose.msra.mxu1 %v1616_v4 }
 0x54c   : > { %2961 = vmatprep.subr.msk.bf16.mxu1 %vm543_vm1, %v4839_v32 }
 0x54d   : > { %2817 = vmatmul.mubr.bf16.gmra.mrb[20].mxu1 %v4864_v7 }
 0x54e   : > { %2828 = vmatprep.mubr.msk.bf16.mxu1 %vm543_vm1, %v4831_v5 }
 0x553   : > { %2823 = vmatpush3.bf16.xpose.msra.mxu1 %v1618_v38 }
 0x554   : > { %2962 = vmatprep.subr.msk.bf16.mxu1 %vm543_vm1, %v3608_v50 }
 0x55b   : > { %2825 = vmatpush3.bf16.xpose.msra.mxu1 %v1620_v59 }
 0x55c   : > { %2963 = vmatprep.subr.msk.bf16.mxu1 %vm543_vm1, %v3600_v58 }
 0x563   : > { %2827 = vmatpush3.bf16.xpose.msra.mxu1 %v1622_v2 }
 0x564   : > { %2892 = vmatprep.subr.bf16.mxu1 %v3433_v35 }
 0x56a   : > { %2829 = vmatmul.mubr.msk.bf16.vlgmr.msra.gmra.mrb[16].mxu1 %vm543_vm1, %v4846_v30 }
 0x56b   : > { %2832 = vmatprep.mubr.msk.bf16.mxu1 %vm543_vm1, %v3672_v20  ;;  %2893 = vmatpush3.bf16.msra.mxu1 %v3433_v35 }
 0x56c   : > { %2894 = vmatprep.subr.bf16.mxu1 %v4824_v47 }
 0x56f   : > { %2895 = vmatpush3.bf16.msra.mxu1 %v4824_v47 }
 0x570   : > { %2896 = vmatprep.subr.bf16.mxu1 %v3581_v3 }
 0x572   : > { %2833 = vmatmul.mubr.msk.bf16.gmra.mrb[20].mxu1 %vm543_vm1, %v3670_v42 }
 0x573   : > { %2897 = vmatpush3.bf16.msra.mxu1 %v3581_v3 }
 0x574   : > { %2898 = vmatprep.subr.bf16.mxu1 %v3573_v61 }
 0x577   : > { %2899 = vmatpush3.bf16.msra.mxu1 %v3573_v61 }
 0x5f8   : > { %v4298_v50 = vpop.f32.mrb[8].mxu1 }
 0x5f9   : > { %4865 = vst [vmem:[#allocation22_spill] sm:$0xff] %v4298_v50  ;;  %v4300_v20 = vpop.f32.mrb[9].mxu1  ;;  %v4875_v50 = vld [vmem:[#allocation12_spill] sm:$0xff] }
 0x5fa   : > { %4866 = vst [vmem:[#allocation9_spill] sm:$0xff] %v4300_v20  ;;  %v4302_v58 = vpop.f32.mrb[10].mxu1 }
 0x5fb   : > { %4867 = vst [vmem:[#allocation24_spill] sm:$0xff] %v4302_v58  ;;  %v4304_v22 = vpop.f32.mrb[11].mxu1  ;;  %v4874_v58 = vld [vmem:[#allocation3_spill] sm:$0xff] }
 0x5fc   : > { %4868 = vst [vmem:[#allocation10_spill] sm:$0xff] %v4304_v22 }
 0x600   : > { %v4306_v6 = vpop.f32.mrb[12].mxu1 }
 0x601   : > { %4869 = vst [vmem:[#allocation26_spill] sm:$0xff] %v4306_v6  ;;  %v4308_v13 = vpop.f32.mrb[13].mxu1 }
 0x602   : > { %4870 = vst [vmem:[#allocation32_spill] sm:$0xff] %v4308_v13  ;;  %v4310_v62 = vpop.f32.mrb[14].mxu1 }
 0x603   : > { %4871 = vst [vmem:[#allocation41_spill] sm:$0xff] %v4310_v62  ;;  %v4312_v42 = vpop.f32.mrb[15].mxu1 }
 0x604   : > { %4872 = vst [vmem:[#allocation42_spill] sm:$0xff] %v4312_v42 }
 0x63d   : > { %v2830_v3 = vpop.f32.mrb[16].mxu1 }
 0x63e   : > { %v1658_v16 = vpop.f32.mrb[17].mxu1  ;;  %v1695_v4 = vsel %vm609_vm7, %v2830_v3, -inf }
 0x63f   : > { %v2831_v56 = vpop.f32.mrb[18].mxu1  ;;  %v1689_v61 = vsel %vm609_vm7, %v1658_v16, -inf }
 0x640   : > { %1690 = vmax.xlane.f32.xlu1 %v1689_v61  ;;  %v1661_v63 = vpop.f32.mrb[19].mxu1  ;;  %v1698_v38 = vsel %vm609_vm7, %v2831_v56, -inf }
 0x641   : > { %v1692_v34 = vsel %vm609_vm7, %v1661_v63, -inf }
 0x642   : > { %1693 = vmax.xlane.f32.xlu0 %v1692_v34 }
 0x644   : > { %1696 = vmax.xlane.f32.xlu1 %v1695_v4  ;;  %v1866_v4 = vsel %vm543_vm1, %v4826_v24, %v4831_v5 }
 0x645   : > { %v2834_v7 = vpop.f32.mrb[20].mxu1 }
 0x646   : > { %1699 = vmax.xlane.f32.xlu0 %v1698_v38  ;;  %v1674_v59 = vpop.f32.mrb[21].mxu1  ;;  %v1707_v61 = vsel %vm609_vm7, %v2834_v7, -inf  ;;  %v4873_v38 = vld [vmem:[#allocation30_spill] sm:$0xff] }
 0x647   : > { %v2835_v2 = vpop.f32.mrb[22].mxu1  ;;  %v1701_v62 = vsel %vm609_vm7, %v1674_v59, -inf  ;;  %v1870_v13 = vsel %vm556_vm2, %v1866_v4, %v4873_v38 }
 0x648   : > { %1702 = vmax.xlane.f32.xlu1 %v1701_v62  ;;  %v1677_v6 = vpop.f32.mrb[23].mxu1  ;;  %v1710_v34 = vsel %vm609_vm7, %v2835_v2, -inf  ;;  %v1874_v62 = vsel %vm565_vm3, %v1870_v13, %v4874_v58 }
 0x649   : > { %v1704_v42 = vsel %vm609_vm7, %v1677_v6, -inf  ;;  %v1878_v22 = vsel %vm300_vm0, %v1874_v62, %v4875_v50 }
 0x64a   : > { %1705 = vmax.xlane.f32.xlu0 %v1704_v42  ;;  %v4876_v42 = vld [vmem:[#allocation29_spill] sm:$0xff] }
 0x64b   : > { %v1882_v20 = vsel %vm582_vm4, %v1878_v22, %v4876_v42 }
 0x64c   : > { %1708 = vmax.xlane.f32.xlu1 %v1707_v61 }
 0x64e   : > { %1711 = vmax.xlane.f32.xlu0 %v1710_v34  ;;  %v1886_v34 = vsel %vm591_vm5, %v1882_v20, %v4877_v31 }
 0x64f   : > { %v1890_v4 = vsel %vm600_vm6, %v1886_v34, %v3429_v33  ;;  %v1867_v33 = vsel %vm543_vm1, %v4844_v60, %v4846_v30 }
 0x650   : > { %v1894_v22 = vsel %vm609_vm7, %v1890_v4, %v3433_v35 }
 0x6cd   : > { %v1691_v61 = vpop.xlane.xlu1 %1690 }
 0x6ce   : > { %v1713_v25 = vsub.f32 %v1658_v16, %v1691_v61 }
 0x6cf   : > { %v1694_v11 = vpop.xlane.xlu0 %1693 }
 0x6d0   : > { %v1721_v57 = vmul.f32 1.442695, %v1713_v25  ;;  %v1714_v5 = vsub.f32 %v1661_v63, %v1694_v11  ;;  %v1898_v11 = vsel %vm618_vm8, %v1894_v22, %v3437_v37 }
 0x6d1   : > { %v1697_v54 = vpop.xlane.xlu1 %1696  ;;  %v1902_v63 = vsel %vm627_vm9, %v1898_v11, %v3441_v39 }
 0x6d2   : > { %v1723_v38 = vmul.f32 1.442695, %v1714_v5  ;;  %v1715_v58 = vsub.f32 %v2830_v3, %v1697_v54  ;;  %3043 = vpow2.f32 %v1721_v57  ;;  %v1871_v3 = vsel %vm556_vm2, %v1867_v33, %v3473_v52 }
 0x6d3   : > { %v1700_v13 = vpop.xlane.xlu0 %1699  ;;  %v1875_v37 = vsel %vm565_vm3, %v1871_v3, %v3231_v9 }
 0x6d4   : > { %3045 = vpow2.f32 %v1723_v38  ;;  %v1725_v50 = vmul.f32 1.442695, %v1715_v58  ;;  %v1716_v62 = vsub.f32 %v2831_v56, %v1700_v13 }
 0x6d5   : > { %v1703_v42 = vpop.xlane.xlu1 %1702 }
 0x6d6   : > { %v1727_v31 = vmul.f32 1.442695, %v1716_v62  ;;  %v1717_v20 = vsub.f32 %v1674_v59, %v1703_v42  ;;  %3047 = vpow2.f32 %v1725_v50 }
 0x6d7   : > { %v1706_v25 = vpop.xlane.xlu0 %1705 }
 0x6d8   : > { %3049 = vpow2.f32 %v1727_v31  ;;  %v1729_v54 = vmul.f32 1.442695, %v1717_v20  ;;  %v1718_v57 = vsub.f32 %v1677_v6, %v1706_v25  ;;  %v1906_v6 = vsel %vm636_vm10, %v1902_v63, %v3445_v41  ;;  %v4883_v20 = vld [vmem:[#allocation33_spill] sm:$0xff] }
 0x6d9   : > { %v1709_v16 = vpop.xlane.xlu1 %1708  ;;  %v1910_v9 = vsel %vm645_vm11, %v1906_v6, %v3452_v43 }
 0x6da   : > { %v1731_v35 = vmul.f32 1.442695, %v1718_v57  ;;  %v1719_v56 = vsub.f32 %v2834_v7, %v1709_v16  ;;  %3051 = vpow2.f32 %v1729_v54  ;;  %v1879_v7 = vsel %vm300_vm0, %v1875_v37, %v3413_v27 }
 0x6db   : > { %v1712_v59 = vpop.xlane.xlu0 %1711  ;;  %v1883_v41 = vsel %vm582_vm4, %v1879_v7, %v3411_v26  ;;  %v1914_v38 = vsel %vm654_vm12, %v1910_v9, %v4817_v10 }
 0x6dc   : > { %3053 = vpow2.f32 %v1731_v35  ;;  %v1733_v61 = vmul.f32 1.442695, %v1719_v56  ;;  %v1720_v30 = vsub.f32 %v2835_v2, %v1712_v59  ;;  %v4350_v34 = vpop.eup %3043  ;;  %v1887_v13 = vsel %vm591_vm5, %v1883_v41, %v4818_v19 }
 0x6dd   : > { %v1918_v26 = vsel %vm663_vm13, %v1914_v38, %v4819_v15  ;;  %v1891_v10 = vsel %vm600_vm6, %v1887_v13, %v4822_v46  ;;  %v3147_v46 = vld [vmem:[%s4700_s4] sm:$0xff]  }
 0x6de   : > { %v4354_v52 = vpop.eup %3045  ;;  %v1735_v5 = vmul.f32 1.442695, %v1720_v30  ;;  %3055 = vpow2.f32 %v1733_v61  ;;  %v1922_v19 = vsel %vm672_vm14, %v1918_v26, %v4823_v0  ;;  %v1895_v15 = vsel %vm609_vm7, %v1891_v10, %v4824_v47 }
 0x6df   : > { %v1761_v39 = vpack.c.bf16 %v4354_v52, %v4350_v34  ;;  %v1930_v31 = vmul.bf16 %v3147_v46, %v1922_v19  ;;  %v1899_v0 = vsel %vm618_vm8, %v1895_v15, %v4829_v18  ;;  %v1346_v26 = vsel %vm609_vm7, %v4146_v49, 0.0  ;;  %v4886_v19 = vld [vmem:[#allocation18_spill] sm:$0xff]  ;;  %v4887_v46 = vld [vmem:[#allocation7_spill] sm:$0xff] }
 0x6e0   : > { %3057 = vpow2.f32 %v1735_v5  ;;  %v4362_v2 = vpop.eup %3047  ;;  %v1903_v47 = vsel %vm627_vm9, %v1899_v0, %v3435_v36  ;;  %v1352_v10 = vsel %vm609_vm7, %v4158_v1, 0.0  ;;  %v1355_v15 = vsel %vm609_vm7, %v4886_v19, 0.0  ;;  %v4888_v0 = vld [vmem:[#allocation19_spill] sm:$0xff] }
 0x6e1   : > { %2844 = vmatprep.mubr.msk.bf16.mxu0 %vm609_vm7, %v1761_v39  ;;  %v1740_v49 = vsel %vm609_vm7, %v4354_v52, 0.0 }
 0x6e2   : > { %v4365_v4 = vpop.eup %3049 }
 0x6e3   : > { %v1762_v27 = vpack.c.bf16 %v4365_v4, %v4362_v2  ;;  %v1746_v1 = vsel %vm609_vm7, %v4365_v4, 0.0 }
 0x6e4   : > { %v4373_v58 = vpop.eup %3051 }
 0x6e5   : > { %2845 = vmatmul.mubr.msk.bf16.vlgmr.msra.gmra.mrb[24].mxu0 %vm609_vm7, %v1762_v27  ;;  %v1749_v4 = vsel %vm609_vm7, %v4373_v58, 0.0 }
 0x6e6   : > { %v4378_v50 = vpop.eup %3053  ;;  %2853 = vmatpush3.bf16.msra.mxu0 %v4091_v21 }
 0x6e7   : > { %2854 = vmatprep.subr.bf16.mxu0 %v4182_v48  ;;  %v1763_v62 = vpack.c.bf16 %v4378_v50, %v4373_v58 }
 0x6e8   : > { %v4388_v22 = vpop.eup %3055 }
 0x6e9   : > { %2848 = vmatprep.mubr.msk.bf16.mxu0 %vm609_vm7, %v1763_v62  ;;  %v1349_v62 = vsel %vm609_vm7, %v4150_v17, 0.0  ;;  %v1743_v17 = vsel %vm609_vm7, %v4362_v2, 0.0 }
 0x6ea   : > { %v4393_v42 = vpop.eup %3057  ;;  %2855 = vmatpush3.bf16.msra.mxu0 %v4182_v48  ;;  %v1907_v48 = vsel %vm636_vm10, %v1903_v47, %v4835_v55  ;;  %v4889_v47 = vld [vmem:[#allocation8_spill] sm:$0xff] }
 0x6eb   : > { %2856 = vmatprep.subr.bf16.mxu0 %v4202_v14  ;;  %v1764_v21 = vpack.c.bf16 %v4393_v42, %v4388_v22  ;;  %v1364_v52 = vsel %vm609_vm7, %v4889_v47, 0.0 }
 0x6ed   : > { %2849 = vmatmul.mubr.msk.bf16.gmra.mrb[28].mxu0 %vm609_vm7, %v1764_v21  ;;  %v1737_v21 = vsel %vm609_vm7, %v4350_v34, 0.0  ;;  %v1361_v34 = vsel %vm609_vm7, %v4888_v0, 0.0  ;;  %v1755_v0 = vsel %vm609_vm7, %v4388_v22, 0.0 }
 0x6ee   : > { %2857 = vmatpush3.bf16.msra.mxu0 %v4202_v14  ;;  %2868 = vmatprep.mubr.bf16.mxu0 %v1930_v31  ;;  %v1911_v14 = vsel %vm645_vm11, %v1907_v48, %v4837_v40  ;;  %v1358_v31 = vsel %vm609_vm7, %v4887_v46, 0.0  ;;  %v4890_v48 = vld [vmem:[#allocation20_spill] sm:$0xff] }
 0x6ef   : > { %2858 = vmatprep.subr.bf16.mxu0 %v4215_v44  ;;  %v1915_v18 = vsel %vm654_vm12, %v1911_v14, %v4839_v32  ;;  %v3148_v32 = vld [vmem:[%s4700_s4 + $0x8] sm:$0xff]   ;;  %v1367_v2 = vsel %vm609_vm7, %v4890_v48, 0.0  ;;  %v1752_v14 = vsel %vm609_vm7, %v4378_v50, 0.0  ;;  %v1758_v48 = vsel %vm609_vm7, %v4393_v42, 0.0 }
 0x6f0   : > { %v1919_v36 = vsel %vm663_vm13, %v1915_v18, %v4841_v53  ;;  %v4878_v53 = vld [vmem:[#allocation37_spill] sm:$0xff] }
 0x6f1   : > { %v1924_v55 = vsel %vm672_vm14, %v1919_v36, %v4842_v12  ;;  %v4880_v12 = vld [vmem:[#allocation38_spill] sm:$0xff] }
 0x6f2   : > { %2859 = vmatpush3.bf16.msra.mxu0 %v4215_v44  ;;  %v1931_v44 = vmul.bf16 %v3148_v32, %v1924_v55 }
 0x6f3   : > { %2860 = vmatprep.subr.bf16.mxu0 %v4224_v8 }
 0x6f6   : > { %2861 = vmatpush3.bf16.msra.mxu0 %v4224_v8  ;;  %v4879_v8 = vmul.bf16 %v3745_v28, %v4878_v53  ;;  %v4882_v28 = vld [vmem:[#allocation34_spill] sm:$0xff] }
 0x6f7   : > { %2862 = vmatprep.subr.bf16.mxu0 %v4233_v51 }
 0x6fa   : > { %2863 = vmatpush3.bf16.msra.mxu0 %v4233_v51  ;;  %v2007_v51 = vsel %vm543_vm1, %v3452_v43, 0 }
 0x6fb   : > { %2864 = vmatprep.subr.bf16.mxu0 %v4244_v29 }
 0x6fe   : > { %2865 = vmatpush3.bf16.msra.mxu0 %v4244_v29  ;;  %v4881_v29 = vmul.bf16 %v3750_v45, %v4880_v12  ;;  %v2013_v45 = vsel %vm543_vm1, %v4883_v20, 0 }
 0x6ff   : > { %2866 = vmatprep.subr.bf16.mxu0 %v4253_v23 }
 0x702   : > { %2867 = vmatpush3.bf16.msra.mxu0 %v4253_v23  ;;  %v2009_v23 = vsel %vm543_vm1, %v4837_v40, 0 }
 0x703   : > { %2964 = vmatprep.subr.msk.bf16.mxu0 %vm543_vm1, %v3452_v43  ;;  %v2011_v43 = vsel %vm543_vm1, %v4882_v28, 0 }
 0x705   : > { %2869 = vmatmul.mubr.bf16.vlgmr.msra.gmra.mrb[32].mxu0 %v1931_v44 }
 0x706   : > { %2872 = vmatprep.mubr.bf16.mxu0 %v4879_v8 }
 0x70b   : > { %2877 = vmatpush3.bf16.xpose.msra.mxu0 %v2007_v51 }
 0x70c   : > { %2965 = vmatprep.subr.msk.bf16.mxu0 %vm543_vm1, %v4837_v40  ;;  %v4885_v40 = vld [vmem:[#allocation35_spill] sm:$0xff] }
 0x70d   : > { %2873 = vmatmul.mubr.bf16.gmra.mrb[36].mxu0 %v4881_v29 }
 0x70e   : > { %2884 = vmatprep.mubr.msk.bf16.mxu0 %vm543_vm1, %v4826_v24  ;;  %v4884_v24 = vld [vmem:[#allocation36_spill] sm:$0xff] }
 0x713   : > { %2879 = vmatpush3.bf16.xpose.msra.mxu0 %v2009_v23 }
 0x714   : > { %2966 = vmatprep.subr.msk.bf16.mxu0 %vm543_vm1, %v4882_v28 }
 0x71b   : > { %2881 = vmatpush3.bf16.xpose.msra.mxu0 %v2011_v43 }
 0x71c   : > { %2967 = vmatprep.subr.msk.bf16.mxu0 %vm543_vm1, %v4883_v20 }
 0x723   : > { %2883 = vmatpush3.bf16.xpose.msra.mxu0 %v2013_v45 }
 0x72a   : > { %2885 = vmatmul.mubr.msk.bf16.vlgmr.msra.gmra.mrb[32].mxu0 %vm543_vm1, %v4844_v60 }
 0x72b   : > { %2888 = vmatprep.mubr.msk.bf16.mxu0 %vm543_vm1, %v4884_v24 }
 0x732   : > { %2889 = vmatmul.mubr.msk.bf16.gmra.mrb[36].mxu0 %vm543_vm1, %v4885_v40 }
 0x7b8   : > { %v4463_v25 = vpop.f32.mrb[24].mxu0 }
 0x7b9   : > { %v4465_v11 = vpop.f32.mrb[25].mxu0 }
 0x7ba   : > { %v4467_v33 = vpop.f32.mrb[26].mxu0 }
 0x7bb   : > { %v4469_v54 = vpop.f32.mrb[27].mxu0 }
 0x7c0   : > { %v4471_v57 = vpop.f32.mrb[28].mxu0 }
 0x7c1   : > { %v4473_v3 = vpop.f32.mrb[29].mxu0 }
 0x7c2   : > { %v4475_v16 = vpop.f32.mrb[30].mxu0 }
 0x7c3   : > { %v4477_v60 = vpop.f32.mrb[31].mxu0 }
 0x7fd   : > { %v4479_v35 = vpop.f32.mrb[32].mxu0 }
 0x7fe   : > { %v2049_v56 = vpop.f32.mrb[33].mxu0  ;;  %v2086_v30 = vsel %vm609_vm7, %v4479_v35, -inf }
 0x7ff   : > { %v4481_v63 = vpop.f32.mrb[34].mxu0  ;;  %v2080_v59 = vsel %vm609_vm7, %v2049_v56, -inf }
 0x800   : > { %2081 = vmax.xlane.f32.xlu1 %v2080_v59  ;;  %v2052_v37 = vpop.f32.mrb[35].mxu0  ;;  %v2089_v5 = vsel %vm609_vm7, %v4481_v63, -inf }
 0x801   : > { %v2083_v61 = vsel %vm609_vm7, %v2052_v37, -inf }
 0x802   : > { %2084 = vmax.xlane.f32.xlu0 %v2083_v61 }
 0x804   : > { %2087 = vmax.xlane.f32.xlu1 %v2086_v30 }
 0x805   : > { %v4487_v6 = vpop.f32.mrb[36].mxu0 }
 0x806   : > { %2090 = vmax.xlane.f32.xlu0 %v2089_v5  ;;  %v2065_v7 = vpop.f32.mrb[37].mxu0  ;;  %v2098_v38 = vsel %vm609_vm7, %v4487_v6, -inf }
 0x807   : > { %v4491_v39 = vpop.f32.mrb[38].mxu0  ;;  %v2092_v9 = vsel %vm609_vm7, %v2065_v7, -inf }
 0x808   : > { %2093 = vmax.xlane.f32.xlu1 %v2092_v9  ;;  %v2068_v41 = vpop.f32.mrb[39].mxu0  ;;  %v2101_v13 = vsel %vm609_vm7, %v4491_v39, -inf }
 0x809   : > { %v2095_v27 = vsel %vm609_vm7, %v2068_v41, -inf }
 0x80a   : > { %2096 = vmax.xlane.f32.xlu0 %v2095_v27 }
 0x80c   : > { %2099 = vmax.xlane.f32.xlu1 %v2098_v38 }
 0x80e   : > { %2102 = vmax.xlane.f32.xlu0 %v2101_v13 }
 0x810   : > { %1347 = vadd.xlane.f32.xlu1 %v1346_v26 }
 0x812   : > { %1350 = vadd.xlane.f32.xlu0 %v1349_v62 }
 0x814   : > { %1353 = vadd.xlane.f32.xlu1 %v1352_v10 }
 0x816   : > { %1356 = vadd.xlane.f32.xlu0 %v1355_v15 }
 0x818   : > { %1738 = vadd.xlane.f32.xlu1 %v1737_v21 }
 0x81a   : > { %1741 = vadd.xlane.f32.xlu0 %v1740_v49 }
 0x81c   : > { %1744 = vadd.xlane.f32.xlu1 %v1743_v17 }
 0x81e   : > { %1747 = vadd.xlane.f32.xlu0 %v1746_v1 }
 0x820   : > { %1359 = vadd.xlane.f32.xlu1 %v1358_v31 }
 0x822   : > { %1362 = vadd.xlane.f32.xlu0 %v1361_v34 }
 0x824   : > { %1365 = vadd.xlane.f32.xlu1 %v1364_v52 }
 0x826   : > { %1368 = vadd.xlane.f32.xlu0 %v1367_v2 }
 0x828   : > { %1750 = vadd.xlane.f32.xlu1 %v1749_v4 }
 0x82a   : > { %1753 = vadd.xlane.f32.xlu0 %v1752_v14  ;;  %v4891_v14 = vld [vmem:[#allocation9_spill] sm:$0xff] }
 0x88d   : > { %v2082_v18 = vpop.xlane.xlu1 %2081 }
 0x88e   : > { %v2104_v36 = vsub.f32 %v2049_v56, %v2082_v18 }
 0x88f   : > { %v2085_v55 = vpop.xlane.xlu0 %2084 }
 0x890   : > { %v2112_v32 = vmul.f32 1.442695, %v2104_v36  ;;  %v2105_v44 = vsub.f32 %v2052_v37, %v2085_v55  ;;  %v4892_v36 = vld [vmem:[#allocation10_spill] sm:$0xff] }
 0x891   : > { %v2088_v53 = vpop.xlane.xlu1 %2087 }
 0x892   : > { %v2114_v8 = vmul.f32 1.442695, %v2105_v44  ;;  %v2106_v51 = vsub.f32 %v4479_v35, %v2088_v53  ;;  %3059 = vpow2.f32 %v2112_v32 }
 0x893   : > { %v2091_v12 = vpop.xlane.xlu0 %2090 }
 0x894   : > { %3061 = vpow2.f32 %v2114_v8  ;;  %v2116_v29 = vmul.f32 1.442695, %v2106_v51  ;;  %v2107_v58 = vsub.f32 %v4481_v63, %v2091_v12  ;;  %v4893_v51 = vld [vmem:[#allocation22_spill] sm:$0xff] }
 0x895   : > { %v2094_v23 = vpop.xlane.xlu1 %2093 }
 0x896   : > { %3063 = vpow2.f32 %v2116_v29  ;;  %v2118_v28 = vmul.f32 1.442695, %v2107_v58  ;;  %v2108_v50 = vsub.f32 %v2065_v7, %v2094_v23  ;;  %v4894_v29 = vld [vmem:[#allocation24_spill] sm:$0xff] }
 0x897   : > { %v2097_v43 = vpop.xlane.xlu0 %2096 }
 0x898   : > { %3065 = vpow2.f32 %v2118_v28  ;;  %v2120_v20 = vmul.f32 1.442695, %v2108_v50  ;;  %v2109_v45 = vsub.f32 %v2068_v41, %v2097_v43 }
 0x899   : > { %v2100_v24 = vpop.xlane.xlu1 %2099 }
 0x89a   : > { %v2122_v40 = vmul.f32 1.442695, %v2109_v45  ;;  %v2110_v56 = vsub.f32 %v4487_v6, %v2100_v24  ;;  %3067 = vpow2.f32 %v2120_v20 }
 0x89b   : > { %v2103_v35 = vpop.xlane.xlu0 %2102 }
 0x89c   : > { %3069 = vpow2.f32 %v2122_v40  ;;  %v2124_v59 = vmul.f32 1.442695, %v2110_v56  ;;  %v2111_v37 = vsub.f32 %v4491_v39, %v2103_v35  ;;  %v3060_v61 = vpop.eup %3059 }
 0x89d   : > { %v1348_v63 = vpop.xlane.xlu1 %1347  ;;  %v2128_v19 = vsel %vm609_vm7, %v3060_v61, 0.0 }
 0x89e   : > { %v3062_v30 = vpop.eup %3061  ;;  %3071 = vpow2.f32 %v2124_v59  ;;  %v2126_v5 = vmul.f32 1.442695, %v2111_v37  ;;  %v4895_v37 = vld [vmem:[#allocation39_spill] sm:$0xff] }
 0x89f   : > { %3073 = vrcp.f32 %v1348_v63  ;;  %v1351_v7 = vpop.xlane.xlu0 %1350  ;;  %v2152_v9 = vpack.c.bf16 %v3062_v30, %v3060_v61  ;;  %v2131_v49 = vsel %vm609_vm7, %v3062_v30, 0.0  ;;  %v955_v61 = vsel %vm609_vm7, %v4895_v37, 0.0 }
 0x8a0   : > { %v3064_v27 = vpop.eup %3063  ;;  %3075 = vpow2.f32 %v2126_v5 }
 0x8a1   : > { %3077 = vrcp.f32 %v1351_v7  ;;  %2900 = vmatprep.mubr.msk.bf16.mxu1 %vm609_vm7, %v2152_v9  ;;  %v1354_v6 = vpop.xlane.xlu1 %1353  ;;  %v2134_v41 = vsel %vm609_vm7, %v3064_v27, 0.0  ;;  %v4896_v7 = vld [vmem:[#allocation40_spill] sm:$0xff] }
 0x8a2   : > { %v3066_v38 = vpop.eup %3065  ;;  %3079 = vrcp.f32 %v1354_v6  ;;  %2135 = vadd.xlane.f32.xlu1 %v2134_v41  ;;  %v958_v9 = vsel %vm609_vm7, %v4896_v7, 0.0  ;;  %v4897_v6 = vld [vmem:[#allocation21_spill] sm:$0xff]  ;;  %v4907_v7 = vld [vmem:[#allocation4_spill] sm:$0xff] }
 0x8a3   : > { %v2153_v39 = vpack.c.bf16 %v3066_v38, %v3064_v27  ;;  %v1357_v13 = vpop.xlane.xlu0 %1356  ;;  %v2137_v26 = vsel %vm609_vm7, %v3066_v38, 0.0  ;;  %v961_v41 = vsel %vm609_vm7, %v4897_v6, 0.0 }
 0x8a4   : > { %3081 = vrcp.f32 %v1357_v13  ;;  %2138 = vadd.xlane.f32.xlu0 %v2137_v26  ;;  %v3068_v62 = vpop.eup %3067  ;;  %v4898_v13 = vld [vmem:[#allocation11_spill] sm:$0xff] }
 0x8a5   : > { %2901 = vmatmul.mubr.msk.bf16.vlgmr.msra.gmra.mrb[24].mxu1 %vm609_vm7, %v2153_v39  ;;  %v1739_v10 = vpop.xlane.xlu1 %1738  ;;  %v2140_v22 = vsel %vm609_vm7, %v3068_v62, 0.0  ;;  %v964_v26 = vsel %vm609_vm7, %v4898_v13, 0.0 }
 0x8a6   : > { %v3070_v15 = vpop.eup %3069  ;;  %3083 = vrcp.f32 %v1739_v10  ;;  %2129 = vadd.xlane.f32.xlu1 %v2128_v19  ;;  %v4900_v19 = vld [vmem:[#allocation42_spill] sm:$0xff] }
 0x8a7   : > { %v1742_v21 = vpop.xlane.xlu0 %1741  ;;  %v2154_v17 = vpack.c.bf16 %v3070_v15, %v3068_v62  ;;  %v2143_v8 = vsel %vm609_vm7, %v3070_v15, 0.0  ;;  %v4899_v62 = vld [vmem:[#allocation32_spill] sm:$0xff] }
 0x8a8   : > { %v3072_v1 = vpop.eup %3071  ;;  %3085 = vrcp.f32 %v1742_v21  ;;  %2132 = vadd.xlane.f32.xlu0 %v2131_v49 }
 0x8a9   : > { %v3074_v46 = vpop.eup %3073  ;;  %v1745_v31 = vpop.xlane.xlu1 %1744  ;;  %2904 = vmatprep.mubr.msk.bf16.mxu1 %vm609_vm7, %v2154_v17  ;;  %v2146_v50 = vsel %vm609_vm7, %v3072_v1, 0.0 }
 0x8aa   : > { %v3076_v34 = vpop.eup %3075  ;;  %3087 = vrcp.f32 %v1745_v31  ;;  %1756 = vadd.xlane.f32.xlu1 %v1755_v0  ;;  %v4543_v18 = vmul.f32 %v3074_v46, %v4891_v14  ;;  %v4903_v31 = vld [vmem:[#allocation26_spill] sm:$0xff] }
 0x8ab   : > { %v3078_v47 = vpop.eup %3077  ;;  %v1748_v52 = vpop.xlane.xlu0 %1747  ;;  %v2155_v2 = vpack.c.bf16 %v3076_v34, %v3072_v1  ;;  %v2149_v24 = vsel %vm609_vm7, %v3076_v34, 0.0  ;;  %v4902_v1 = vld [vmem:[#allocation13_spill] sm:$0xff] }
 0x8ac   : > { %v3080_v4 = vpop.eup %3079  ;;  %3089 = vrcp.f32 %v1748_v52  ;;  %1759 = vadd.xlane.f32.xlu0 %v1758_v48  ;;  %v4546_v55 = vmul.f32 %v3078_v47, %v4892_v36  ;;  %v970_v46 = vsel %vm609_vm7, %v4902_v1, 0.0  ;;  %v4904_v34 = vld [vmem:[#allocation41_spill] sm:$0xff] }
 0x8ad   : > { %v1360_v32 = vpop.xlane.xlu1 %1359  ;;  %2905 = vmatmul.mubr.msk.bf16.gmra.mrb[28].mxu1 %vm609_vm7, %v2155_v2  ;;  %v1465_v12 = vmul.f32 %v3080_v4, %v4893_v51  ;;  %v4905_v48 = vld [vmem:[#allocation25_spill] sm:$0xff] }
 0x8ae   : > { %v3082_v44 = vpop.eup %3081  ;;  %3091 = vrcp.f32 %v1360_v32  ;;  %2141 = vadd.xlane.f32.xlu1 %v2140_v22  ;;  %v1471_v42 = vpack.c.bf16 %v4546_v55, %v4543_v18  ;;  %v973_v2 = vsel %vm609_vm7, %v4905_v48, 0.0  ;;  %v4906_v18 = vld [vmem:[#allocation15_spill] sm:$0xff]  ;;  %v4913_v1 = vld [vmem:[#allocation5_spill] sm:$0xff] }
 0x8af   : > { %v1363_v53 = vpop.xlane.xlu0 %1362  ;;  %v1466_v58 = vmul.f32 %v3082_v44, %v4894_v29  ;;  %v976_v36 = vsel %vm609_vm7, %v4906_v18, 0.0 }
 0x8b0   : > { %v3084_v23 = vpop.eup %3083  ;;  %3093 = vrcp.f32 %v1363_v53  ;;  %2144 = vadd.xlane.f32.xlu0 %v2143_v8 }
 0x8b1   : > { %v1366_v28 = vpop.xlane.xlu1 %1365  ;;  %v1472_v43 = vpack.c.bf16 %v1466_v58, %v1465_v12  ;;  %v1854_v40 = vmul.f32 %v3084_v23, %v4465_v11 }
 0x8b2   : > { %v3086_v20 = vpop.eup %3085  ;;  %3095 = vrcp.f32 %v1366_v28  ;;  %2147 = vadd.xlane.f32.xlu1 %v2146_v50 }
 0x8b3   : > { %v1369_v45 = vpop.xlane.xlu0 %1368  ;;  %v1855_v56 = vmul.f32 %v3086_v20, %v4469_v54 }
 0x8b4   : > { %v3088_v35 = vpop.eup %3087  ;;  %3097 = vrcp.f32 %v1369_v45  ;;  %2150 = vadd.xlane.f32.xlu0 %v2149_v24 }
 0x8b5   : > { %v1751_v59 = vpop.xlane.xlu1 %1750  ;;  %v1862_v63 = vpack.c.bf16 %v1855_v56, %v1854_v40  ;;  %v1856_v27 = vmul.f32 %v3088_v35, %v4463_v25  ;;  %v4901_v25 = vld [vmem:[#allocation23_spill] sm:$0xff] }
 0x8b6   : > { %v3090_v30 = vpop.eup %3089  ;;  %3099 = vrcp.f32 %v1751_v59  ;;  %956 = vadd.xlane.f32.xlu1 %v955_v61 }
 0x8b7   : > { %v1754_v5 = vpop.xlane.xlu0 %1753  ;;  %v1857_v11 = vmul.f32 %v3090_v30, %v4467_v33  ;;  %v967_v33 = vsel %vm609_vm7, %v4901_v25, 0.0 }
 0x8b8   : > { %v3092_v54 = vpop.eup %3091  ;;  %3101 = vrcp.f32 %v1754_v5  ;;  %959 = vadd.xlane.f32.xlu0 %v958_v9  ;;  %v4908_v9 = vld [vmem:[#allocation28_spill] sm:$0xff] }
 0x8b9   : > { %v1863_v38 = vpack.c.bf16 %v1857_v11, %v1856_v27  ;;  %v1467_v10 = vmul.f32 %v3092_v54, %v4899_v62 }
 0x8ba   : > { %v3094_v39 = vpop.eup %3093  ;;  %962 = vadd.xlane.f32.xlu1 %v961_v41  ;;  %v4909_v41 = vld [vmem:[#allocation27_spill] sm:$0xff] }
 0x8bb   : > { %v1468_v15 = vmul.f32 %v3094_v39, %v4900_v19  ;;  %v4910_v39 = vld [vmem:[#allocation16_spill] sm:$0xff]  ;;  %v4911_v19 = vld [vmem:[#allocation31_spill] sm:$0xff] }
 0x8bc   : > { %v3096_v21 = vpop.eup %3095  ;;  %965 = vadd.xlane.f32.xlu0 %v964_v26 }
 0x8bd   : > { %v1473_v49 = vpack.c.bf16 %v1468_v15, %v1467_v10  ;;  %v1469_v0 = vmul.f32 %v3096_v21, %v4903_v31  ;;  %v4912_v21 = vld [vmem:[#allocation6_spill] sm:$0xff]  ;;  %v4914_v31 = vld [vmem:[#allocation17_spill] sm:$0xff] }
 0x8be   : > { %v3098_v17 = vpop.eup %3097  ;;  %968 = vadd.xlane.f32.xlu1 %v967_v33 }
 0x8bf   : > { %v1470_v47 = vmul.f32 %v3098_v17, %v4904_v34 }
 0x8c0   : > { %v3100_v52 = vpop.eup %3099  ;;  %971 = vadd.xlane.f32.xlu0 %v970_v46 }
 0x8c1   : > { %v1474_v4 = vpack.c.bf16 %v1470_v47, %v1469_v0  ;;  %v4582_v55 = vmul.f32 %v3100_v52, %v4473_v3  ;;  %v3009_v3 = vld [vmem:[%s4698_s2] sm:$0xff]  }
 0x8c2   : > { %v3102_v14 = vpop.eup %3101  ;;  %974 = vadd.xlane.f32.xlu1 %v973_v2  ;;  %2908 = vmatprep.subr.bf16.mxu1 %v3009_v3 }
 0x8c3   : > { %v4585_v32 = vmul.f32 %v3102_v14, %v4477_v60  ;;  %v3010_v60 = vld [vmem:[%s4698_s2 + $0x8] sm:$0xff]   ;;  %2909 = vmatpush3.bf16.msra.mxu1 %v3009_v3 }
 0x8c4   : > { %977 = vadd.xlane.f32.xlu0 %v976_v36  ;;  %2910 = vmatprep.subr.bf16.mxu1 %v3010_v60 }
 0x8c5   : > { %v1864_v22 = vpack.c.bf16 %v4585_v32, %v4582_v55 }
 0x8c7   : > { %2911 = vmatpush3.bf16.msra.mxu1 %v3010_v60 }
 0x8d3   : > { %2261 = vrot.lane.b32.xlu1 %v1471_v42, %s3158_s11 }
 0x8d7   : > { %2273 = vrot.lane.b32.xlu1 %v1862_v63, %s3157_s10 }
 0x8da   : > { %2263 = vrot.lane.b32.xlu0 %v1472_v43, %s3158_s11 }
 0x8db   : > { %2275 = vrot.lane.b32.xlu1 %v1863_v38, %s3157_s10 }
 0x8de   : > { %2265 = vrot.lane.b32.xlu0 %v1473_v49, %s3158_s11 }
 0x8df   : > { %2267 = vrot.lane.b32.xlu1 %v1474_v4, %s3158_s11 }
 0x92f   : > { %v2136_v44 = vpop.xlane.xlu1 %2135 }
 0x931   : > { %v2139_v42 = vpop.xlane.xlu0 %2138 }
 0x933   : > { %v2130_v53 = vpop.xlane.xlu1 %2129 }
 0x935   : > { %v2133_v8 = vpop.xlane.xlu0 %2132 }
 0x937   : > { %v1757_v51 = vpop.xlane.xlu1 %1756 }
 0x938   : > { %3103 = vrcp.f32 %v1757_v51 }
 0x939   : > { %v1760_v12 = vpop.xlane.xlu0 %1759 }
 0x93a   : > { %3105 = vrcp.f32 %v1760_v12 }
 0x93b   : > { %v2142_v29 = vpop.xlane.xlu1 %2141 }
 0x93d   : > { %v2145_v58 = vpop.xlane.xlu0 %2144 }
 0x93f   : > { %v2148_v23 = vpop.xlane.xlu1 %2147 }
 0x941   : > { %v2151_v28 = vpop.xlane.xlu0 %2150 }
 0x942   : > { %v3104_v50 = vpop.eup %3103 }
 0x943   : > { %v957_v43 = vpop.xlane.xlu1 %956  ;;  %v4602_v24 = vmul.f32 %v3104_v50, %v4471_v57 }
 0x944   : > { %v3106_v20 = vpop.eup %3105  ;;  %3107 = vrcp.f32 %v957_v43 }
 0x945   : > { %v960_v45 = vpop.xlane.xlu0 %959  ;;  %v4605_v40 = vmul.f32 %v3106_v20, %v4475_v16 }
 0x946   : > { %3109 = vrcp.f32 %v960_v45 }
 0x947   : > { %v963_v56 = vpop.xlane.xlu1 %962  ;;  %v1865_v35 = vpack.c.bf16 %v4605_v40, %v4602_v24 }
 0x948   : > { %3111 = vrcp.f32 %v963_v56 }
 0x949   : > { %v966_v59 = vpop.xlane.xlu0 %965 }
 0x94a   : > { %3113 = vrcp.f32 %v966_v59 }
 0x94b   : > { %v969_v37 = vpop.xlane.xlu1 %968 }
 0x94c   : > { %3115 = vrcp.f32 %v969_v37 }
 0x94d   : > { %v972_v61 = vpop.xlane.xlu0 %971 }
 0x94e   : > { %v3108_v63 = vpop.eup %3107  ;;  %3117 = vrcp.f32 %v972_v61 }
 0x94f   : > { %v975_v30 = vpop.xlane.xlu1 %974  ;;  %v4610_v16 = vmul.f32 %v3108_v63, %v4907_v7 }
 0x950   : > { %v3110_v5 = vpop.eup %3109  ;;  %3119 = vrcp.f32 %v975_v30 }
 0x951   : > { %v978_v57 = vpop.xlane.xlu0 %977  ;;  %v4613_v27 = vmul.f32 %v3110_v5, %v4908_v9 }
 0x952   : > { %v3112_v11 = vpop.eup %3111  ;;  %3121 = vrcp.f32 %v978_v57 }
 0x953   : > { %v1080_v54 = vpack.c.bf16 %v4613_v27, %v4610_v16  ;;  %v4618_v38 = vmul.f32 %v3112_v11, %v4909_v41  ;;  %3123 = vrcp.f32 %v2136_v44  ;;  %v2262_v63 = vpop.permute.xlu1 %2261 }
 0x954   : > { %v3114_v6 = vpop.eup %3113  ;;  %3125 = vrcp.f32 %v2139_v42 }
 0x955   : > { %v4621_v13 = vmul.f32 %v3114_v6, %v4910_v39  ;;  %3127 = vrcp.f32 %v2130_v53  ;;  %v2264_v57 = vpop.permute.xlu0 %2263  ;;  %v2295_v40 = vsel %vm543_vm1, %v1080_v54, %v2262_v63 }
 0x956   : > { %v3116_v26 = vpop.eup %3115  ;;  %3129 = vrcp.f32 %v2133_v8 }
 0x957   : > { %v1081_v62 = vpack.c.bf16 %v4621_v13, %v4618_v38  ;;  %v4626_v15 = vmul.f32 %v3116_v26, %v4911_v19  ;;  %3131 = vrcp.f32 %v2142_v29  ;;  %v2274_v30 = vpop.permute.xlu1 %2273  ;;  %v2539_v19 = vld [vmem:[%s4699_s3] ss:$0 sm:$0xff] }
 0x958   : > { %v3118_v10 = vpop.eup %3117  ;;  %3133 = vrcp.f32 %v2148_v23  ;;  %v2306_v32 = vsel %vm556_vm2, %v2295_v40, %v2274_v30 }
 0x959   : > { %v4629_v25 = vmul.f32 %v3118_v10, %v4912_v21  ;;  %3135 = vrcp.f32 %v2151_v28  ;;  %v2266_v24 = vpop.permute.xlu0 %2265  ;;  %v2298_v55 = vsel %vm543_vm1, %v1081_v62, %v2264_v57 }
 0x95a   : > { %v3120_v33 = vpop.eup %3119  ;;  %3137 = vrcp.f32 %v2145_v58 }
 0x95b   : > { %v1082_v49 = vpack.c.bf16 %v4629_v25, %v4626_v15  ;;  %v4634_v46 = vmul.f32 %v3120_v33, %v4913_v1  ;;  %v2276_v5 = vpop.permute.xlu1 %2275 }
 0x95c   : > { %v3122_v17 = vpop.eup %3121  ;;  %v2308_v9 = vsel %vm556_vm2, %v2298_v55, %v2276_v5 }
 0x95d   : > { %v4637_v0 = vmul.f32 %v3122_v17, %v4914_v31  ;;  %v3124_v47 = vpop.eup %3123  ;;  %v2301_v27 = vsel %vm543_vm1, %v1082_v49, %v2266_v24 }
 0x95e   : > { %v3126_v48 = vpop.eup %3125 }
 0x95f   : > { %v1083_v34 = vpack.c.bf16 %v4637_v0, %v4634_v46  ;;  %v3128_v4 = vpop.eup %3127  ;;  %v2268_v7 = vpop.permute.xlu1 %2267 }
 0x960   : > { %v3130_v18 = vpop.eup %3129 }
 0x961   : > { %v3132_v53 = vpop.eup %3131  ;;  %v2304_v38 = vsel %vm543_vm1, %v1083_v34, %v2268_v7 }
 0x962   : > { %v3134_v29 = vpop.eup %3133 }
 0x963   : > { %v3136_v58 = vpop.eup %3135 }
 0x964   : > { %v3138_v50 = vpop.eup %3137 }
 0x978   : > { %v2902_v52 = vpop.f32.mrb[24].mxu1 }
 0x979   : > { %v2206_v2 = vpop.f32.mrb[25].mxu1  ;;  %v2247_v36 = vmul.f32 %v3124_v47, %v2902_v52 }
 0x97a   : > { %v2903_v14 = vpop.f32.mrb[26].mxu1  ;;  %v2245_v51 = vmul.f32 %v3128_v4, %v2206_v2 }
 0x97b   : > { %v2248_v3 = vmul.f32 %v3126_v48, %v2903_v14  ;;  %v2209_v60 = vpop.f32.mrb[27].mxu1 }
 0x97c   : > { %v2246_v12 = vmul.f32 %v3130_v18, %v2209_v60 }
 0x97d   : > { %v2254_v44 = vpack.c.bf16 %v2248_v3, %v2247_v36 }
 0x97e   : > { %v2253_v42 = vpack.c.bf16 %v2246_v12, %v2245_v51 }
 0x97f   : > { %2287 = vrot.lane.b32.xlu1 %v2254_v44, %s3159_s14 }
 0x980   : > { %v2906_v8 = vpop.f32.mrb[28].mxu1  ;;  %2285 = vrot.lane.b32.xlu0 %v2253_v42, %s3159_s14 }
 0x981   : > { %v2222_v23 = vpop.f32.mrb[29].mxu1  ;;  %v2251_v43 = vmul.f32 %v3134_v29, %v2906_v8 }
 0x982   : > { %v2907_v28 = vpop.f32.mrb[30].mxu1  ;;  %v2249_v56 = vmul.f32 %v3132_v53, %v2222_v23 }
 0x983   : > { %v2252_v20 = vmul.f32 %v3136_v58, %v2907_v28  ;;  %v2225_v45 = vpop.f32.mrb[31].mxu1  ;;  %2279 = vrot.lane.b32.xlu1 %v1865_v35, %s3157_s10 }
 0x984   : > { %v2250_v59 = vmul.f32 %v3138_v50, %v2225_v45  ;;  %2277 = vrot.lane.b32.xlu0 %v1864_v22, %s3157_s10  ;;  %s2484_s10 = sshll.u32 %s4916_s25, 3 }
 0x985   : > { %v2256_v37 = vpack.c.bf16 %v2252_v20, %v2251_v43  ;;  %s253_s16 = scalar_lea.vmem %s4702_s6, %s2484_s10 }
 0x986   : > { %v2255_v61 = vpack.c.bf16 %v2250_v59, %v2249_v56 }
 0x987   : > { %2291 = vrot.lane.b32.xlu1 %v2256_v37, %s3159_s14 }
 0x988   : > { %2289 = vrot.lane.b32.xlu0 %v2255_v61, %s3159_s14 }
 0x9f1   : > { %v2288_v35 = vpop.permute.xlu1 %2287 }
 0x9f2   : > { %v2286_v22 = vpop.permute.xlu0 %2285  ;;  %v2316_v6 = vsel %vm565_vm3, %v2308_v9, %v2288_v35 }
 0x9f3   : > { %v2314_v11 = vsel %vm565_vm3, %v2306_v32, %v2286_v22 }
 0x9f4   : > { %2912 = vmatprep.mubr.msk.bf16.mxu1 %vm300_vm0, %v2314_v11 }
 0x9f5   : > { %v2280_v41 = vpop.permute.xlu1 %2279  ;;  %2913 = vmatmul.mubr.msk.bf16.vlgmr.msra.gmra.mrb[32].mxu1 %vm300_vm0, %v2316_v6 }
 0x9f6   : > { %v2278_v16 = vpop.permute.xlu0 %2277  ;;  %v2312_v26 = vsel %vm556_vm2, %v2304_v38, %v2280_v41 }
 0x9f7   : > { %v2310_v39 = vsel %vm556_vm2, %v2301_v27, %v2278_v16 }
 0x9f9   : > { %v2292_v54 = vpop.permute.xlu1 %2291 }
 0x9fa   : > { %v2290_v13 = vpop.permute.xlu0 %2289  ;;  %v2320_v10 = vsel %vm565_vm3, %v2312_v26, %v2292_v54 }
 0x9fb   : > { %v2318_v62 = vsel %vm565_vm3, %v2310_v39, %v2290_v13 }
 0x9fc   : > { %2916 = vmatprep.mubr.msk.bf16.mxu1 %vm300_vm0, %v2318_v62 }
 0x9fd   : > { %2917 = vmatmul.mubr.msk.bf16.gmra.mrb[36].mxu1 %vm300_vm0, %v2320_v10 }
 0xac8   : > { %v2914_v15 = vpop.f32.mrb[32].mxu1 }
 0xac9   : > { %v2390_v21 = vadd.f32 %v2914_v15, %v2539_v19  ;;  %v2381_v25 = vpop.f32.mrb[33].mxu1 }
 0xaca   : > { %v2382_v33 = vadd.f32 %v2539_v19, %v2381_v25  ;;  %v2915_v49 = vpop.f32.mrb[34].mxu1 }
 0xacb   : > { %2414 = vst.msk [vmem:[%s253_s16 + $0x10] sm:$0xff] %vm300_vm0, %v2390_v21  ;;  %v2393_v17 = vadd.f32 %v2915_v49, %v2539_v19  ;;  %v2384_v1 = vpop.f32.mrb[35].mxu1 }
 0xacc   : > { %2412 = vst.msk [vmem:[%s253_s16] sm:$0xff] %vm300_vm0, %v2382_v33  ;;  %v2385_v46 = vadd.f32 %v2539_v19, %v2384_v1 }
 0xacd   : > { %2415 = vst.msk [vmem:[%s253_s16 + $0x18] sm:$0xff] %vm300_vm0, %v2393_v17 }
 0xace   : > { %2413 = vst.msk [vmem:[%s253_s16 + $0x8] sm:$0xff] %vm300_vm0, %v2385_v46 }
 0xad0   : > { %v2918_v31 = vpop.f32.mrb[36].mxu1 }
 0xad1   : > { %v2406_v0 = vadd.f32 %v2918_v31, %v2539_v19  ;;  %v2397_v34 = vpop.f32.mrb[37].mxu1 }
 0xad2   : > { %v2398_v47 = vadd.f32 %v2539_v19, %v2397_v34  ;;  %v2919_v52 = vpop.f32.mrb[38].mxu1 }
 0xad3   : > { %2418 = vst.msk [vmem:[%s253_s16 + $0x30] sm:$0xff] %vm300_vm0, %v2406_v0  ;;  %v2409_v48 = vadd.f32 %v2919_v52, %v2539_v19  ;;  %v2400_v2 = vpop.f32.mrb[39].mxu1 }
 0xad4   : > { %2416 = vst.msk [vmem:[%s253_s16 + $0x20] sm:$0xff] %vm300_vm0, %v2398_v47  ;;  %v2401_v4 = vadd.f32 %v2539_v19, %v2400_v2 }
 0xad5   : > { %2419 = vst.msk [vmem:[%s253_s16 + $0x38] sm:$0xff] %vm300_vm0, %v2409_v48 }
 0xad6   : > { %2417 = vst.msk [vmem:[%s253_s16 + $0x28] sm:$0xff] %vm300_vm0, %v2401_v4 }
 0xad7 PF: > { %s16_s21 = sadd.s32 1, %s3155_s21  }
 0xad8   : > { %p13_p4 = scmp.ge.s32.totalorder %s16_s21, 4  }
 0xada   :  { %15 = sbr.rel (!%p13_p4) target bundleno = 1 (0x1), region = 74 }

</bundles_post_ra>
